<compile_context>
chip_gen: v6e
topology: v6e:2x2x1
jax: 0.10.0
libtpu: 0.0.40
codegen_flags: <defaults>
</compile_context>

<pallas_src>
import functools

import jax
import jax.numpy as jnp
from jax import lax
from jax.experimental import pallas as pl
from jax.experimental.pallas import tpu as pltpu


# ------------------------------- fused kernel ------------------------------- #

def _inverted_residual_kernel(
    x_ref,      # (H, W, Cin)        one batch element, NHWC
    we_ref,     # (Cin, Hp)          expand weight  (BN1 scale folded in)
    b1_ref,     # (1, Hp)            BN1 bias
    wd_ref,     # (3, 3, Hp)         depthwise weight (BN2 scale folded in)
    b2_ref,     # (1, Hp)            BN2 bias
    wp_ref,     # (Hp, Cout)         project weight (BN3 scale folded in)
    b3_ref,     # (1, Cout)          BN3 bias
    o_ref,      # (TH_out, W_out, Cout)
    hid_ref,    # VMEM scratch (TH_hid, W+2, Hp): spatially zero-padded hidden
    *,
    h_in, w_in, cin, cout, hidden_pad, stride, th_out, w_out,
    has_expand, use_res,
):
    t = pl.program_id(1)

    th_hid = (th_out - 1) * stride + 3          # hidden rows needed (with halo)
    ih_top = t * (th_out * stride) - 1          # input row of hidden row 0
    ih_bot = ih_top + th_hid - 1                # input row of last hidden row

    we = we_ref[...]
    b1 = b1_ref[...]

    def expand_rows(xr):
        # xr: (R, W, Cin) f32 -> (R, W, hidden_pad) after expand (+BN1+ReLU6)
        r = xr.shape[0]
        if cin <= 8:
            # tiny K: MXU would be <2% utilised -> VPU broadcast-FMAs instead
            h = xr[:, :, 0:1] * we[0]
            for ci in range(1, cin):
                h = h + xr[:, :, ci:ci + 1] * we[ci]
        else:
            h = jnp.dot(xr.reshape(r * w_in, cin), we,
                        preferred_element_type=jnp.float32)
            h = h.reshape(r, w_in, hidden_pad)
        if has_expand:
            h = jnp.clip(h + b1, 0.0, 6.0)
        return h

    # ---- 1. expand into spatially zero-padded hidden tile (VMEM resident) --
    hid_ref[...] = jnp.zeros_like(hid_ref)       # halo rows/cols stay zero

    n_int = th_hid - 2                            # interior rows: always valid
    row0 = pl.multiple_of(t * (th_out * stride), th_out * stride)
    x_int = x_ref[pl.ds(row0, n_int), :, :].astype(jnp.float32)
    hid_ref[pl.ds(1, n_int), pl.ds(1, w_in), :] = expand_rows(x_int)

    @pl.when(ih_top >= 0)                         # top halo row (zero at image top)
    def _():
        x_top = x_ref[pl.ds(ih_top, 1), :, :].astype(jnp.float32)
        hid_ref[pl.ds(0, 1), pl.ds(1, w_in), :] = expand_rows(x_top)

    @pl.when(ih_bot <= h_in - 1)                  # bottom halo row
    def _():
        x_bot = x_ref[pl.ds(ih_bot, 1), :, :].astype(jnp.float32)
        hid_ref[pl.ds(th_hid - 1, 1), pl.ds(1, w_in), :] = expand_rows(x_bot)

    # ---- 2. 3x3 depthwise conv (+BN2 bias+ReLU6), strided output directly --
    wd = wd_ref[...]

    def dsl(start, size):
        return pl.ds(start, size) if stride == 1 else pl.ds(start, size, stride)

    acc = jnp.zeros((th_out, w_out, hidden_pad), jnp.float32)
    for kh in range(3):
        for kw in range(3):
            patch = hid_ref[dsl(kh, th_out), dsl(kw, w_out), :]
            acc = acc + patch * wd[kh, kw]
    dw = jnp.clip(acc + b2_ref[...], 0.0, 6.0)

    # ---- 3. 1x1 project (+BN3 bias) (+ residual) ----------------------------
    y = jnp.dot(dw.reshape(th_out * w_out, hidden_pad), wp_ref[...],
                preferred_element_type=jnp.float32)
    y = y + b3_ref[...]
    if use_res:  # stride == 1 and cin == cout: output rows == input rows
        r = x_ref[pl.ds(row0, th_out), :, :].astype(jnp.float32)
        y = y + r.reshape(th_out * w_in, cin)
    o_ref[...] = y.reshape(th_out, w_out, cout).astype(o_ref.dtype)


# --------------------------------- wrapper ---------------------------------- #

def _round_up(x, m):
    return ((x + m - 1) // m) * m


def _pick_row_tile(h_out, target=8):
    for d in range(min(target, h_out), 0, -1):
        if h_out % d == 0:
            return d
    return h_out


def _fold_bn(gamma, beta, mean, var, eps=1e-5):
    scale = gamma / jnp.sqrt(var + eps)
    bias = beta - mean * scale
    return scale, bias


def inverted_residual_forward(x_nchw, p):
    """Forward of InvertedResidual.  Input/output are NCHW like PyTorch."""
    inp, oup, stride = p["inp"], p["oup"], p["stride"]
    expand_ratio, hidden = p["expand_ratio"], p["hidden"]
    has_expand = expand_ratio != 1
    use_res = (stride == 1) and (inp == oup)

    N, _, H, W = x_nchw.shape
    H_out = (H - 1) // stride + 1
    W_out = (W - 1) // stride + 1
    hp = _round_up(hidden, 128)                     # lane-dense hidden channels
    f32 = jnp.float32

    # Fold BN scales into conv weights once; pad hidden channels to `hp`.
    if has_expand:
        s1, b1 = _fold_bn(*p["bn1"])
        we = p["w_exp"] * s1[None, :]               # (inp, hidden)
    else:
        we = jnp.eye(inp, dtype=f32)                # identity "expand"
        b1 = jnp.zeros((hidden,), f32)
    we = jnp.pad(we, ((0, 0), (0, hp - hidden)))
    b1 = jnp.pad(b1, (0, hp - hidden)).reshape(1, hp)

    s2, b2 = _fold_bn(*p["bn2"])
    wd = jnp.pad(p["w_dw"] * s2[None, None, :],
                 ((0, 0), (0, 0), (0, hp - hidden)))
    b2 = jnp.pad(b2, (0, hp - hidden)).reshape(1, hp)

    s3, b3 = _fold_bn(*p["bn3"])
    wp = jnp.pad(p["w_proj"] * s3[None, :], ((0, hp - hidden), (0, 0)))
    b3 = b3.reshape(1, oup)

    x = jnp.transpose(x_nchw, (0, 2, 3, 1))         # NCHW -> NHWC

    th_out = _pick_row_tile(H_out)
    n_tiles = H_out // th_out
    th_hid = (th_out - 1) * stride + 3

    kern = functools.partial(
        _inverted_residual_kernel,
        h_in=H, w_in=W, cin=inp, cout=oup, hidden_pad=hp, stride=stride,
        th_out=th_out, w_out=W_out, has_expand=has_expand, use_res=use_res)

    flops = (2 * N * H * W * inp * hidden
             + 2 * N * H_out * W_out * 9 * hidden
             + 2 * N * H_out * W_out * hidden * oup)
    bytes_accessed = 4 * (x.size + N * H_out * W_out * oup
                          + we.size + wd.size + wp.size)

    # TODO(synk): for very large H*W, switch the whole-image input block to
    # halo'd row-tile input blocks (and optionally bf16 activations) to bound
    # VMEM and HBM traffic; at MobileNet sizes the full image per batch is small.
    y = pl.pallas_call(
        kern,
        out_shape=jax.ShapeDtypeStruct((N, H_out, W_out, oup), x.dtype),
        grid_spec=pltpu.PrefetchScalarGridSpec(
            num_scalar_prefetch=0,
            grid=(N, n_tiles),
            in_specs=[
                pl.BlockSpec((None, H, W, inp), lambda n, t: (n, 0, 0, 0)),
                pl.BlockSpec((inp, hp), lambda n, t: (0, 0)),
                pl.BlockSpec((1, hp), lambda n, t: (0, 0)),
                pl.BlockSpec((3, 3, hp), lambda n, t: (0, 0, 0)),
                pl.BlockSpec((1, hp), lambda n, t: (0, 0)),
                pl.BlockSpec((hp, oup), lambda n, t: (0, 0)),
                pl.BlockSpec((1, oup), lambda n, t: (0, 0)),
            ],
            out_specs=pl.BlockSpec((None, th_out, W_out, oup),
                                   lambda n, t: (n, t, 0, 0)),
            scratch_shapes=[pltpu.VMEM((th_hid, W + 2, hp), jnp.float32)],
        ),
        compiler_params=pltpu.CompilerParams(
            dimension_semantics=("parallel", "parallel"),
            vmem_limit_bytes=32 * 1024 * 1024,
        ),
        cost_estimate=pl.CostEstimate(
            flops=flops, transcendentals=0, bytes_accessed=bytes_accessed),
    )(x, we, b1, wd, b2, wp, b3)

    return jnp.transpose(y, (0, 3, 1, 2))           # NHWC -> NCHW


# ------------------------------- params & ref -------------------------------- #

def init_inverted_residual_params(key, inp, oup, stride, expand_ratio):
    assert stride in (1, 2)
    hidden = int(round(inp * expand_ratio))
    ks = jax.random.split(key, 12)
    f32 = jnp.float32

    def bn_params(k0, k1, k2, c):
        gamma = 1.0 + 0.1 * jax.random.normal(k0, (c,), f32)
        beta = 0.1 * jax.random.normal(k1, (c,), f32)
        mean = 0.1 * jax.random.normal(k2, (c,), f32)
        var = jnp.ones((c,), f32)
        return (gamma, beta, mean, var)

    p = {"inp": inp, "oup": oup, "stride": stride,
         "expand_ratio": expand_ratio, "hidden": hidden}
    if expand_ratio != 1:
        # Conv2d(inp, hidden, 1) weight (hidden, inp, 1, 1) -> (inp, hidden)
        p["w_exp"] = 0.3 * jax.random.normal(ks[0], (inp, hidden), f32)
        p["bn1"] = bn_params(ks[1], ks[2], ks[3], hidden)
    # Depthwise Conv2d(hidden, hidden, 3, groups=hidden) -> (3, 3, hidden)
    p["w_dw"] = 0.3 * jax.random.normal(ks[4], (3, 3, hidden), f32)
    p["bn2"] = bn_params(ks[5], ks[6], ks[7], hidden)
    # Project Conv2d(hidden, oup, 1) weight (oup, hidden, 1, 1) -> (hidden, oup)
    p["w_proj"] = 0.3 * jax.random.normal(ks[8], (hidden, oup), f32)
    p["bn3"] = bn_params(ks[9], ks[10], ks[11], oup)
    return p


def _ref_forward(x_nchw, p):
    dn = ("NHWC", "HWIO", "NHWC")
    x = jnp.transpose(x_nchw, (0, 2, 3, 1))
    h = x
    if p["expand_ratio"] != 1:
        s1, b1 = _fold_bn(*p["bn1"])
        h = lax.conv_general_dilated(h, p["w_exp"][None, None], (1, 1), "VALID",
                                     dimension_numbers=dn)
        h = jnp.clip(h * s1 + b1, 0.0, 6.0)
    s2, b2 = _fold_bn(*p["bn2"])
    hidden = p["hidden"]
    wdw = p["w_dw"].reshape(3, 3, 1, hidden)
    h = lax.conv_general_dilated(h, wdw, (p["stride"], p["stride"]),
                                 ((1, 1), (1, 1)), dimension_numbers=dn,
                                 feature_group_count=hidden)
    h = jnp.clip(h * s2 + b2, 0.0, 6.0)
    s3, b3 = _fold_bn(*p["bn3"])
    h = lax.conv_general_dilated(h, p["w_proj"][None, None], (1, 1), "VALID",
                                 dimension_numbers=dn)
    h = h * s3 + b3
    if p["stride"] == 1 and p["inp"] == p["oup"]:
        h = h + x
    return jnp.transpose(h, (0, 3, 1, 2))


# ------------------------------------ main ----------------------------------- #

if __name__ == "__main__":
    key = jax.random.PRNGKey(0)
    kp, kx = jax.random.split(key)

    # InvertedResidual(inp=4, oup=4, stride=1, expand_ratio=6) -> hidden=24,
    # use_res_connect=True.  Input x: NCHW (2, 4, 16, 16).
    inp, oup, stride, expand_ratio = 4, 4, 1, 6
    params = init_inverted_residual_params(kp, inp, oup, stride, expand_ratio)
    x = jax.random.normal(kx, (2, inp, 16, 16), jnp.float32)

    out = jax.block_until_ready(inverted_residual_forward(x, params))
    assert out.shape == (2, oup, 16, 16), out.shape
    ref = _ref_forward(x, params)
    max_err = float(jnp.max(jnp.abs(out - ref)))
    assert max_err < 1e-2, f"max abs err vs reference: {max_err}"

    # Secondary config: expand_ratio=1 (no expand conv) exercises the identity
    # path of the same fused kernel.
    params1 = init_inverted_residual_params(kp, 4, 4, 1, 1)
    out1 = jax.block_until_ready(inverted_residual_forward(x, params1))
    ref1 = _ref_forward(x, params1)
    max_err1 = float(jnp.max(jnp.abs(out1 - ref1)))
    assert max_err1 < 1e-2, f"max abs err (expand_ratio=1): {max_err1}"

    print("KERNEL_OK")
</pallas_src>

<mosaic_0001>
module attributes {stable_mosaic.version = 11 : i64} {
  func.func @_inverted_residual_kernel(%arg0: i32, %arg1: i32, %arg2: memref<1x16x16x4xf32, #tpu.memory_space<vmem>>, %arg3: memref<4x128xf32, #tpu.memory_space<vmem>>, %arg4: memref<1x128xf32, #tpu.memory_space<vmem>>, %arg5: memref<3x3x128xf32, #tpu.memory_space<vmem>>, %arg6: memref<1x128xf32, #tpu.memory_space<vmem>>, %arg7: memref<128x4xf32, #tpu.memory_space<vmem>>, %arg8: memref<1x4xf32, #tpu.memory_space<vmem>>, %arg9: memref<1x8x16x4xf32, #tpu.memory_space<vmem>>, %arg10: memref<10x18x128xf32, #tpu.memory_space<vmem>>) attributes {dimension_semantics = [#tpu.dimension_semantics<parallel>, #tpu.dimension_semantics<parallel>], iteration_bounds = array<i64: 2, 2>, scalar_prefetch = 0 : i64, scratch_operands = 1 : i64, tpu.core_type = #tpu.core_type<tc>, window_params = [{transform_indices = @transform_0, window_bounds = array<i64: 1, 16, 16, 4>}, {pipeline_mode = #tpu.pipeline_mode<synchronous>, transform_indices = @transform_1, window_bounds = array<i64: 4, 128>}, {pipeline_mode = #tpu.pipeline_mode<synchronous>, transform_indices = @transform_2, window_bounds = array<i64: 1, 128>}, {pipeline_mode = #tpu.pipeline_mode<synchronous>, transform_indices = @transform_3, window_bounds = array<i64: 3, 3, 128>}, {pipeline_mode = #tpu.pipeline_mode<synchronous>, transform_indices = @transform_4, window_bounds = array<i64: 1, 128>}, {pipeline_mode = #tpu.pipeline_mode<synchronous>, transform_indices = @transform_5, window_bounds = array<i64: 128, 4>}, {pipeline_mode = #tpu.pipeline_mode<synchronous>, transform_indices = @transform_6, window_bounds = array<i64: 1, 4>}, {transform_indices = @transform_7, window_bounds = array<i64: 1, 8, 16, 4>}]} {
    %c8_i32 = arith.constant 8 : i32
    %0 = arith.muli %arg1, %c8_i32 : i32
    %c1_i32 = arith.constant 1 : i32
    %1 = arith.subi %0, %c1_i32 : i32
    %c10_i32 = arith.constant 10 : i32
    %2 = arith.addi %1, %c10_i32 : i32
    %c1_i32_0 = arith.constant 1 : i32
    %3 = arith.subi %2, %c1_i32_0 : i32
    %c0 = arith.constant 0 : index
    %c0_1 = arith.constant 0 : index
    %4 = vector.load %arg3[%c0, %c0_1] : memref<4x128xf32, #tpu.memory_space<vmem>>, vector<4x128xf32>
    %c0_2 = arith.constant 0 : index
    %c0_3 = arith.constant 0 : index
    %5 = vector.load %arg4[%c0_2, %c0_3] : memref<1x128xf32, #tpu.memory_space<vmem>>, vector<1x128xf32>
    %cst = arith.constant 0.000000e+00 : f32
    %6 = vector.broadcast %cst : f32 to vector<10x18x128xf32>
    %c0_4 = arith.constant 0 : index
    %c0_5 = arith.constant 0 : index
    %c0_6 = arith.constant 0 : index
    %7 = vector.load %arg10[%c0_4, %c0_5, %c0_6] : memref<10x18x128xf32, #tpu.memory_space<vmem>>, vector<10x18x128xf32>
    tpu.vector_store %arg10[%c0_4, %c0_5, %c0_6], %6 {strides = array<i32>} : memref<10x18x128xf32, #tpu.memory_space<vmem>>, vector<10x18x128xf32>,
    %c8_i32_7 = arith.constant 8 : i32
    %8 = arith.muli %arg1, %c8_i32_7 : i32
    %9 = tpu.assume_multiple %8, 8 : i32
    %c0_8 = arith.constant 0 : index
    %10 = arith.index_cast %9 : i32 to index
    %c0_9 = arith.constant 0 : index
    %c0_10 = arith.constant 0 : index
    %11 = vector.load %arg2[%c0_8, %10, %c0_9, %c0_10] : memref<1x16x16x4xf32, #tpu.memory_space<vmem>>, vector<1x8x16x4xf32>
    %12 = vector.shape_cast %11 : vector<1x8x16x4xf32> to vector<8x16x4xf32>
    %13 = vector.extract_strided_slice %12 {offsets = [0, 0, 0], sizes = [8, 16, 1], strides = [1, 1, 1]} : vector<8x16x4xf32> to vector<8x16x1xf32>
    %14 = vector.extract_strided_slice %4 {offsets = [0, 0], sizes = [1, 128], strides = [1, 1]} : vector<4x128xf32> to vector<1x128xf32>
    %15 = vector.shape_cast %14 : vector<1x128xf32> to vector<128xf32>
    %16 = vector.shape_cast %15 : vector<128xf32> to vector<1x1x128xf32>
    %17 = vector.broadcast %13 : vector<8x16x1xf32> to vector<8x16x128xf32>
    %18 = vector.broadcast %16 : vector<1x1x128xf32> to vector<8x16x128xf32>
    %19 = arith.mulf %17, %18 : vector<8x16x128xf32>
    %20 = vector.extract_strided_slice %12 {offsets = [0, 0, 1], sizes = [8, 16, 1], strides = [1, 1, 1]} : vector<8x16x4xf32> to vector<8x16x1xf32>
    %21 = vector.extract_strided_slice %4 {offsets = [1, 0], sizes = [1, 128], strides = [1, 1]} : vector<4x128xf32> to vector<1x128xf32>
    %22 = vector.shape_cast %21 : vector<1x128xf32> to vector<128xf32>
    %23 = vector.shape_cast %22 : vector<128xf32> to vector<1x1x128xf32>
    %24 = vector.broadcast %20 : vector<8x16x1xf32> to vector<8x16x128xf32>
    %25 = vector.broadcast %23 : vector<1x1x128xf32> to vector<8x16x128xf32>
    %26 = arith.mulf %24, %25 : vector<8x16x128xf32>
    %27 = arith.addf %19, %26 : vector<8x16x128xf32>
    %28 = vector.extract_strided_slice %12 {offsets = [0, 0, 2], sizes = [8, 16, 1], strides = [1, 1, 1]} : vector<8x16x4xf32> to vector<8x16x1xf32>
    %29 = vector.extract_strided_slice %4 {offsets = [2, 0], sizes = [1, 128], strides = [1, 1]} : vector<4x128xf32> to vector<1x128xf32>
    %30 = vector.shape_cast %29 : vector<1x128xf32> to vector<128xf32>
    %31 = vector.shape_cast %30 : vector<128xf32> to vector<1x1x128xf32>
    %32 = vector.broadcast %28 : vector<8x16x1xf32> to vector<8x16x128xf32>
    %33 = vector.broadcast %31 : vector<1x1x128xf32> to vector<8x16x128xf32>
    %34 = arith.mulf %32, %33 : vector<8x16x128xf32>
    %35 = arith.addf %27, %34 : vector<8x16x128xf32>
    %36 = vector.extract_strided_slice %12 {offsets = [0, 0, 3], sizes = [8, 16, 1], strides = [1, 1, 1]} : vector<8x16x4xf32> to vector<8x16x1xf32>
    %37 = vector.extract_strided_slice %4 {offsets = [3, 0], sizes = [1, 128], strides = [1, 1]} : vector<4x128xf32> to vector<1x128xf32>
    %38 = vector.shape_cast %37 : vector<1x128xf32> to vector<128xf32>
    %39 = vector.shape_cast %38 : vector<128xf32> to vector<1x1x128xf32>
    %40 = vector.broadcast %36 : vector<8x16x1xf32> to vector<8x16x128xf32>
    %41 = vector.broadcast %39 : vector<1x1x128xf32> to vector<8x16x128xf32>
    %42 = arith.mulf %40, %41 : vector<8x16x128xf32>
    %43 = arith.addf %35, %42 : vector<8x16x128xf32>
    %44 = vector.shape_cast %5 : vector<1x128xf32> to vector<1x1x128xf32>
    %45 = vector.broadcast %44 : vector<1x1x128xf32> to vector<8x16x128xf32>
    %46 = arith.addf %43, %45 : vector<8x16x128xf32>
    %cst_11 = arith.constant 0.000000e+00 : f32
    %cst_12 = arith.constant 6.000000e+00 : f32
    %47 = vector.broadcast %cst_11 : f32 to vector<8x16x128xf32>
    %48 = arith.maximumf %47, %46 : vector<8x16x128xf32>
    %49 = vector.broadcast %cst_12 : f32 to vector<8x16x128xf32>
    %50 = arith.minimumf %49, %48 : vector<8x16x128xf32>
    %c1 = arith.constant 1 : index
    %c1_13 = arith.constant 1 : index
    %c0_14 = arith.constant 0 : index
    %51 = vector.load %arg10[%c1, %c1_13, %c0_14] : memref<10x18x128xf32, #tpu.memory_space<vmem>>, vector<8x16x128xf32>
    tpu.vector_store %arg10[%c1, %c1_13, %c0_14], %50 {strides = array<i32>} : memref<10x18x128xf32, #tpu.memory_space<vmem>>, vector<8x16x128xf32>,
    %c0_i32 = arith.constant 0 : i32
    %52 = arith.cmpi sge, %1, %c0_i32 : i32
    %53 = arith.extui %52 : i1 to i32
    %c0_i32_15 = arith.constant 0 : i32
    %54 = arith.cmpi ne, %53, %c0_i32_15 : i32
    scf.if %54 {
      %c0_63 = arith.constant 0 : index
      %146 = arith.index_cast %1 : i32 to index
      %c0_64 = arith.constant 0 : index
      %c0_65 = arith.constant 0 : index
      %147 = vector.load %arg2[%c0_63, %146, %c0_64, %c0_65] : memref<1x16x16x4xf32, #tpu.memory_space<vmem>>, vector<1x1x16x4xf32>
      %148 = vector.shape_cast %147 : vector<1x1x16x4xf32> to vector<1x16x4xf32>
      %149 = vector.extract_strided_slice %148 {offsets = [0, 0, 0], sizes = [1, 16, 1], strides = [1, 1, 1]} : vector<1x16x4xf32> to vector<1x16x1xf32>
      %150 = vector.extract_strided_slice %4 {offsets = [0, 0], sizes = [1, 128], strides = [1, 1]} : vector<4x128xf32> to vector<1x128xf32>
      %151 = vector.shape_cast %150 : vector<1x128xf32> to vector<128xf32>
      %152 = vector.shape_cast %151 : vector<128xf32> to vector<1x1x128xf32>
      %153 = vector.broadcast %149 : vector<1x16x1xf32> to vector<1x16x128xf32>
      %154 = vector.broadcast %152 : vector<1x1x128xf32> to vector<1x16x128xf32>
      %155 = arith.mulf %153, %154 : vector<1x16x128xf32>
      %156 = vector.extract_strided_slice %148 {offsets = [0, 0, 1], sizes = [1, 16, 1], strides = [1, 1, 1]} : vector<1x16x4xf32> to vector<1x16x1xf32>
      %157 = vector.extract_strided_slice %4 {offsets = [1, 0], sizes = [1, 128], strides = [1, 1]} : vector<4x128xf32> to vector<1x128xf32>
      %158 = vector.shape_cast %157 : vector<1x128xf32> to vector<128xf32>
      %159 = vector.shape_cast %158 : vector<128xf32> to vector<1x1x128xf32>
      %160 = vector.broadcast %156 : vector<1x16x1xf32> to vector<1x16x128xf32>
      %161 = vector.broadcast %159 : vector<1x1x128xf32> to vector<1x16x128xf32>
      %162 = arith.mulf %160, %161 : vector<1x16x128xf32>
      %163 = arith.addf %155, %162 : vector<1x16x128xf32>
      %164 = vector.extract_strided_slice %148 {offsets = [0, 0, 2], sizes = [1, 16, 1], strides = [1, 1, 1]} : vector<1x16x4xf32> to vector<1x16x1xf32>
      %165 = vector.extract_strided_slice %4 {offsets = [2, 0], sizes = [1, 128], strides = [1, 1]} : vector<4x128xf32> to vector<1x128xf32>
      %166 = vector.shape_cast %165 : vector<1x128xf32> to vector<128xf32>
      %167 = vector.shape_cast %166 : vector<128xf32> to vector<1x1x128xf32>
      %168 = vector.broadcast %164 : vector<1x16x1xf32> to vector<1x16x128xf32>
      %169 = vector.broadcast %167 : vector<1x1x128xf32> to vector<1x16x128xf32>
      %170 = arith.mulf %168, %169 : vector<1x16x128xf32>
      %171 = arith.addf %163, %170 : vector<1x16x128xf32>
      %172 = vector.extract_strided_slice %148 {offsets = [0, 0, 3], sizes = [1, 16, 1], strides = [1, 1, 1]} : vector<1x16x4xf32> to vector<1x16x1xf32>
      %173 = vector.extract_strided_slice %4 {offsets = [3, 0], sizes = [1, 128], strides = [1, 1]} : vector<4x128xf32> to vector<1x128xf32>
      %174 = vector.shape_cast %173 : vector<1x128xf32> to vector<128xf32>
      %175 = vector.shape_cast %174 : vector<128xf32> to vector<1x1x128xf32>
      %176 = vector.broadcast %172 : vector<1x16x1xf32> to vector<1x16x128xf32>
      %177 = vector.broadcast %175 : vector<1x1x128xf32> to vector<1x16x128xf32>
      %178 = arith.mulf %176, %177 : vector<1x16x128xf32>
      %179 = arith.addf %171, %178 : vector<1x16x128xf32>
      %180 = vector.shape_cast %5 : vector<1x128xf32> to vector<1x1x128xf32>
      %181 = vector.broadcast %180 : vector<1x1x128xf32> to vector<1x16x128xf32>
      %182 = arith.addf %179, %181 : vector<1x16x128xf32>
      %cst_66 = arith.constant 0.000000e+00 : f32
      %cst_67 = arith.constant 6.000000e+00 : f32
      %183 = vector.broadcast %cst_66 : f32 to vector<1x16x128xf32>
      %184 = arith.maximumf %183, %182 : vector<1x16x128xf32>
      %185 = vector.broadcast %cst_67 : f32 to vector<1x16x128xf32>
      %186 = arith.minimumf %185, %184 : vector<1x16x128xf32>
      %c0_68 = arith.constant 0 : index
      %c1_69 = arith.constant 1 : index
      %c0_70 = arith.constant 0 : index
      %187 = vector.load %arg10[%c0_68, %c1_69, %c0_70] : memref<10x18x128xf32, #tpu.memory_space<vmem>>, vector<1x16x128xf32>
      tpu.vector_store %arg10[%c0_68, %c1_69, %c0_70], %186 {strides = array<i32>} : memref<10x18x128xf32, #tpu.memory_space<vmem>>, vector<1x16x128xf32>,
    } else {
    }
    %c15_i32 = arith.constant 15 : i32
    %55 = arith.cmpi sle, %3, %c15_i32 : i32
    %56 = arith.extui %55 : i1 to i32
    %c0_i32_16 = arith.constant 0 : i32
    %57 = arith.cmpi ne, %56, %c0_i32_16 : i32
    scf.if %57 {
      %c0_63 = arith.constant 0 : index
      %146 = arith.index_cast %3 : i32 to index
      %c0_64 = arith.constant 0 : index
      %c0_65 = arith.constant 0 : index
      %147 = vector.load %arg2[%c0_63, %146, %c0_64, %c0_65] : memref<1x16x16x4xf32, #tpu.memory_space<vmem>>, vector<1x1x16x4xf32>
      %148 = vector.shape_cast %147 : vector<1x1x16x4xf32> to vector<1x16x4xf32>
      %149 = vector.extract_strided_slice %148 {offsets = [0, 0, 0], sizes = [1, 16, 1], strides = [1, 1, 1]} : vector<1x16x4xf32> to vector<1x16x1xf32>
      %150 = vector.extract_strided_slice %4 {offsets = [0, 0], sizes = [1, 128], strides = [1, 1]} : vector<4x128xf32> to vector<1x128xf32>
      %151 = vector.shape_cast %150 : vector<1x128xf32> to vector<128xf32>
      %152 = vector.shape_cast %151 : vector<128xf32> to vector<1x1x128xf32>
      %153 = vector.broadcast %149 : vector<1x16x1xf32> to vector<1x16x128xf32>
      %154 = vector.broadcast %152 : vector<1x1x128xf32> to vector<1x16x128xf32>
      %155 = arith.mulf %153, %154 : vector<1x16x128xf32>
      %156 = vector.extract_strided_slice %148 {offsets = [0, 0, 1], sizes = [1, 16, 1], strides = [1, 1, 1]} : vector<1x16x4xf32> to vector<1x16x1xf32>
      %157 = vector.extract_strided_slice %4 {offsets = [1, 0], sizes = [1, 128], strides = [1, 1]} : vector<4x128xf32> to vector<1x128xf32>
      %158 = vector.shape_cast %157 : vector<1x128xf32> to vector<128xf32>
      %159 = vector.shape_cast %158 : vector<128xf32> to vector<1x1x128xf32>
      %160 = vector.broadcast %156 : vector<1x16x1xf32> to vector<1x16x128xf32>
      %161 = vector.broadcast %159 : vector<1x1x128xf32> to vector<1x16x128xf32>
      %162 = arith.mulf %160, %161 : vector<1x16x128xf32>
      %163 = arith.addf %155, %162 : vector<1x16x128xf32>
      %164 = vector.extract_strided_slice %148 {offsets = [0, 0, 2], sizes = [1, 16, 1], strides = [1, 1, 1]} : vector<1x16x4xf32> to vector<1x16x1xf32>
      %165 = vector.extract_strided_slice %4 {offsets = [2, 0], sizes = [1, 128], strides = [1, 1]} : vector<4x128xf32> to vector<1x128xf32>
      %166 = vector.shape_cast %165 : vector<1x128xf32> to vector<128xf32>
      %167 = vector.shape_cast %166 : vector<128xf32> to vector<1x1x128xf32>
      %168 = vector.broadcast %164 : vector<1x16x1xf32> to vector<1x16x128xf32>
      %169 = vector.broadcast %167 : vector<1x1x128xf32> to vector<1x16x128xf32>
      %170 = arith.mulf %168, %169 : vector<1x16x128xf32>
      %171 = arith.addf %163, %170 : vector<1x16x128xf32>
      %172 = vector.extract_strided_slice %148 {offsets = [0, 0, 3], sizes = [1, 16, 1], strides = [1, 1, 1]} : vector<1x16x4xf32> to vector<1x16x1xf32>
      %173 = vector.extract_strided_slice %4 {offsets = [3, 0], sizes = [1, 128], strides = [1, 1]} : vector<4x128xf32> to vector<1x128xf32>
      %174 = vector.shape_cast %173 : vector<1x128xf32> to vector<128xf32>
      %175 = vector.shape_cast %174 : vector<128xf32> to vector<1x1x128xf32>
      %176 = vector.broadcast %172 : vector<1x16x1xf32> to vector<1x16x128xf32>
      %177 = vector.broadcast %175 : vector<1x1x128xf32> to vector<1x16x128xf32>
      %178 = arith.mulf %176, %177 : vector<1x16x128xf32>
      %179 = arith.addf %171, %178 : vector<1x16x128xf32>
      %180 = vector.shape_cast %5 : vector<1x128xf32> to vector<1x1x128xf32>
      %181 = vector.broadcast %180 : vector<1x1x128xf32> to vector<1x16x128xf32>
      %182 = arith.addf %179, %181 : vector<1x16x128xf32>
      %cst_66 = arith.constant 0.000000e+00 : f32
      %cst_67 = arith.constant 6.000000e+00 : f32
      %183 = vector.broadcast %cst_66 : f32 to vector<1x16x128xf32>
      %184 = arith.maximumf %183, %182 : vector<1x16x128xf32>
      %185 = vector.broadcast %cst_67 : f32 to vector<1x16x128xf32>
      %186 = arith.minimumf %185, %184 : vector<1x16x128xf32>
      %c9 = arith.constant 9 : index
      %c1_68 = arith.constant 1 : index
      %c0_69 = arith.constant 0 : index
      %187 = vector.load %arg10[%c9, %c1_68, %c0_69] : memref<10x18x128xf32, #tpu.memory_space<vmem>>, vector<1x16x128xf32>
      tpu.vector_store %arg10[%c9, %c1_68, %c0_69], %186 {strides = array<i32>} : memref<10x18x128xf32, #tpu.memory_space<vmem>>, vector<1x16x128xf32>,
    } else {
    }
    %c0_17 = arith.constant 0 : index
    %c0_18 = arith.constant 0 : index
    %c0_19 = arith.constant 0 : index
    %58 = vector.load %arg5[%c0_17, %c0_18, %c0_19] : memref<3x3x128xf32, #tpu.memory_space<vmem>>, vector<3x3x128xf32>
    %cst_20 = arith.constant 0.000000e+00 : f32
    %59 = vector.broadcast %cst_20 : f32 to vector<8x16x128xf32>
    %c0_21 = arith.constant 0 : index
    %c0_22 = arith.constant 0 : index
    %c0_23 = arith.constant 0 : index
    %60 = vector.load %arg10[%c0_21, %c0_22, %c0_23] : memref<10x18x128xf32, #tpu.memory_space<vmem>>, vector<8x16x128xf32>
    %61 = vector.extract_strided_slice %58 {offsets = [0, 0, 0], sizes = [1, 1, 128], strides = [1, 1, 1]} : vector<3x3x128xf32> to vector<1x1x128xf32>
    %62 = vector.shape_cast %61 : vector<1x1x128xf32> to vector<128xf32>
    %63 = vector.shape_cast %62 : vector<128xf32> to vector<1x1x128xf32>
    %64 = vector.broadcast %63 : vector<1x1x128xf32> to vector<8x16x128xf32>
    %65 = arith.mulf %60, %64 : vector<8x16x128xf32>
    %66 = arith.addf %59, %65 : vector<8x16x128xf32>
    %c0_24 = arith.constant 0 : index
    %c1_25 = arith.constant 1 : index
    %c0_26 = arith.constant 0 : index
    %67 = vector.load %arg10[%c0_24, %c1_25, %c0_26] : memref<10x18x128xf32, #tpu.memory_space<vmem>>, vector<8x16x128xf32>
    %68 = vector.extract_strided_slice %58 {offsets = [0, 1, 0], sizes = [1, 1, 128], strides = [1, 1, 1]} : vector<3x3x128xf32> to vector<1x1x128xf32>
    %69 = vector.shape_cast %68 : vector<1x1x128xf32> to vector<128xf32>
    %70 = vector.shape_cast %69 : vector<128xf32> to vector<1x1x128xf32>
    %71 = vector.broadcast %70 : vector<1x1x128xf32> to vector<8x16x128xf32>
    %72 = arith.mulf %67, %71 : vector<8x16x128xf32>
    %73 = arith.addf %66, %72 : vector<8x16x128xf32>
    %c0_27 = arith.constant 0 : index
    %c2 = arith.constant 2 : index
    %c0_28 = arith.constant 0 : index
    %74 = vector.load %arg10[%c0_27, %c2, %c0_28] : memref<10x18x128xf32, #tpu.memory_space<vmem>>, vector<8x16x128xf32>
    %75 = vector.extract_strided_slice %58 {offsets = [0, 2, 0], sizes = [1, 1, 128], strides = [1, 1, 1]} : vector<3x3x128xf32> to vector<1x1x128xf32>
    %76 = vector.shape_cast %75 : vector<1x1x128xf32> to vector<128xf32>
    %77 = vector.shape_cast %76 : vector<128xf32> to vector<1x1x128xf32>
    %78 = vector.broadcast %77 : vector<1x1x128xf32> to vector<8x16x128xf32>
    %79 = arith.mulf %74, %78 : vector<8x16x128xf32>
    %80 = arith.addf %73, %79 : vector<8x16x128xf32>
    %c1_29 = arith.constant 1 : index
    %c0_30 = arith.constant 0 : index
    %c0_31 = arith.constant 0 : index
    %81 = vector.load %arg10[%c1_29, %c0_30, %c0_31] : memref<10x18x128xf32, #tpu.memory_space<vmem>>, vector<8x16x128xf32>
    %82 = vector.extract_strided_slice %58 {offsets = [1, 0, 0], sizes = [1, 1, 128], strides = [1, 1, 1]} : vector<3x3x128xf32> to vector<1x1x128xf32>
    %83 = vector.shape_cast %82 : vector<1x1x128xf32> to vector<128xf32>
    %84 = vector.shape_cast %83 : vector<128xf32> to vector<1x1x128xf32>
    %85 = vector.broadcast %84 : vector<1x1x128xf32> to vector<8x16x128xf32>
    %86 = arith.mulf %81, %85 : vector<8x16x128xf32>
    %87 = arith.addf %80, %86 : vector<8x16x128xf32>
    %c1_32 = arith.constant 1 : index
    %c1_33 = arith.constant 1 : index
    %c0_34 = arith.constant 0 : index
    %88 = vector.load %arg10[%c1_32, %c1_33, %c0_34] : memref<10x18x128xf32, #tpu.memory_space<vmem>>, vector<8x16x128xf32>
    %89 = vector.extract_strided_slice %58 {offsets = [1, 1, 0], sizes = [1, 1, 128], strides = [1, 1, 1]} : vector<3x3x128xf32> to vector<1x1x128xf32>
    %90 = vector.shape_cast %89 : vector<1x1x128xf32> to vector<128xf32>
    %91 = vector.shape_cast %90 : vector<128xf32> to vector<1x1x128xf32>
    %92 = vector.broadcast %91 : vector<1x1x128xf32> to vector<8x16x128xf32>
    %93 = arith.mulf %88, %92 : vector<8x16x128xf32>
    %94 = arith.addf %87, %93 : vector<8x16x128xf32>
    %c1_35 = arith.constant 1 : index
    %c2_36 = arith.constant 2 : index
    %c0_37 = arith.constant 0 : index
    %95 = vector.load %arg10[%c1_35, %c2_36, %c0_37] : memref<10x18x128xf32, #tpu.memory_space<vmem>>, vector<8x16x128xf32>
    %96 = vector.extract_strided_slice %58 {offsets = [1, 2, 0], sizes = [1, 1, 128], strides = [1, 1, 1]} : vector<3x3x128xf32> to vector<1x1x128xf32>
    %97 = vector.shape_cast %96 : vector<1x1x128xf32> to vector<128xf32>
    %98 = vector.shape_cast %97 : vector<128xf32> to vector<1x1x128xf32>
    %99 = vector.broadcast %98 : vector<1x1x128xf32> to vector<8x16x128xf32>
    %100 = arith.mulf %95, %99 : vector<8x16x128xf32>
    %101 = arith.addf %94, %100 : vector<8x16x128xf32>
    %c2_38 = arith.constant 2 : index
    %c0_39 = arith.constant 0 : index
    %c0_40 = arith.constant 0 : index
    %102 = vector.load %arg10[%c2_38, %c0_39, %c0_40] : memref<10x18x128xf32, #tpu.memory_space<vmem>>, vector<8x16x128xf32>
    %103 = vector.extract_strided_slice %58 {offsets = [2, 0, 0], sizes = [1, 1, 128], strides = [1, 1, 1]} : vector<3x3x128xf32> to vector<1x1x128xf32>
    %104 = vector.shape_cast %103 : vector<1x1x128xf32> to vector<128xf32>
    %105 = vector.shape_cast %104 : vector<128xf32> to vector<1x1x128xf32>
    %106 = vector.broadcast %105 : vector<1x1x128xf32> to vector<8x16x128xf32>
    %107 = arith.mulf %102, %106 : vector<8x16x128xf32>
    %108 = arith.addf %101, %107 : vector<8x16x128xf32>
    %c2_41 = arith.constant 2 : index
    %c1_42 = arith.constant 1 : index
    %c0_43 = arith.constant 0 : index
    %109 = vector.load %arg10[%c2_41, %c1_42, %c0_43] : memref<10x18x128xf32, #tpu.memory_space<vmem>>, vector<8x16x128xf32>
    %110 = vector.extract_strided_slice %58 {offsets = [2, 1, 0], sizes = [1, 1, 128], strides = [1, 1, 1]} : vector<3x3x128xf32> to vector<1x1x128xf32>
    %111 = vector.shape_cast %110 : vector<1x1x128xf32> to vector<128xf32>
    %112 = vector.shape_cast %111 : vector<128xf32> to vector<1x1x128xf32>
    %113 = vector.broadcast %112 : vector<1x1x128xf32> to vector<8x16x128xf32>
    %114 = arith.mulf %109, %113 : vector<8x16x128xf32>
    %115 = arith.addf %108, %114 : vector<8x16x128xf32>
    %c2_44 = arith.constant 2 : index
    %c2_45 = arith.constant 2 : index
    %c0_46 = arith.constant 0 : index
    %116 = vector.load %arg10[%c2_44, %c2_45, %c0_46] : memref<10x18x128xf32, #tpu.memory_space<vmem>>, vector<8x16x128xf32>
    %117 = vector.extract_strided_slice %58 {offsets = [2, 2, 0], sizes = [1, 1, 128], strides = [1, 1, 1]} : vector<3x3x128xf32> to vector<1x1x128xf32>
    %118 = vector.shape_cast %117 : vector<1x1x128xf32> to vector<128xf32>
    %119 = vector.shape_cast %118 : vector<128xf32> to vector<1x1x128xf32>
    %120 = vector.broadcast %119 : vector<1x1x128xf32> to vector<8x16x128xf32>
    %121 = arith.mulf %116, %120 : vector<8x16x128xf32>
    %122 = arith.addf %115, %121 : vector<8x16x128xf32>
    %c0_47 = arith.constant 0 : index
    %c0_48 = arith.constant 0 : index
    %123 = vector.load %arg6[%c0_47, %c0_48] : memref<1x128xf32, #tpu.memory_space<vmem>>, vector<1x128xf32>
    %124 = vector.shape_cast %123 : vector<1x128xf32> to vector<1x1x128xf32>
    %125 = vector.broadcast %124 : vector<1x1x128xf32> to vector<8x16x128xf32>
    %126 = arith.addf %122, %125 : vector<8x16x128xf32>
    %cst_49 = arith.constant 0.000000e+00 : f32
    %cst_50 = arith.constant 6.000000e+00 : f32
    %127 = vector.broadcast %cst_49 : f32 to vector<8x16x128xf32>
    %128 = arith.maximumf %127, %126 : vector<8x16x128xf32>
    %129 = vector.broadcast %cst_50 : f32 to vector<8x16x128xf32>
    %130 = arith.minimumf %129, %128 : vector<8x16x128xf32>
    %131 = vector.shape_cast %130 : vector<8x16x128xf32> to vector<128x128xf32>
    %c0_51 = arith.constant 0 : index
    %c0_52 = arith.constant 0 : index
    %132 = vector.load %arg7[%c0_51, %c0_52] : memref<128x4xf32, #tpu.memory_space<vmem>>, vector<128x4xf32>
    %cst_53 = arith.constant dense<0.000000e+00> : vector<128x4xf32>
    %133 = tpu.matmul %131, %132, %cst_53 {dimension_numbers = #tpu.dot_dimension_numbers<[1], [0], [0], [1], [0, 0, 1, 1], [], []>} : vector<128x128xf32>, vector<128x4xf32>, vector<128x4xf32> -> vector<128x4xf32>
    %c0_54 = arith.constant 0 : index
    %c0_55 = arith.constant 0 : index
    %134 = vector.load %arg8[%c0_54, %c0_55] : memref<1x4xf32, #tpu.memory_space<vmem>>, vector<1x4xf32>
    %135 = vector.broadcast %134 : vector<1x4xf32> to vector<128x4xf32>
    %136 = arith.addf %133, %135 : vector<128x4xf32>
    %c0_56 = arith.constant 0 : index
    %137 = arith.index_cast %9 : i32 to index
    %c0_57 = arith.constant 0 : index
    %c0_58 = arith.constant 0 : index
    %138 = vector.load %arg2[%c0_56, %137, %c0_57, %c0_58] : memref<1x16x16x4xf32, #tpu.memory_space<vmem>>, vector<1x8x16x4xf32>
    %139 = vector.shape_cast %138 : vector<1x8x16x4xf32> to vector<8x16x4xf32>
    %140 = vector.shape_cast %139 : vector<8x16x4xf32> to vector<128x4xf32>
    %141 = arith.addf %136, %140 : vector<128x4xf32>
    %142 = vector.shape_cast %141 : vector<128x4xf32> to vector<8x16x4xf32>
    %c0_59 = arith.constant 0 : index
    %c0_60 = arith.constant 0 : index
    %c0_61 = arith.constant 0 : index
    %c0_62 = arith.constant 0 : index
    %143 = vector.load %arg9[%c0_59, %c0_60, %c0_61, %c0_62] : memref<1x8x16x4xf32, #tpu.memory_space<vmem>>, vector<1x8x16x4xf32>
    %144 = vector.shape_cast %143 : vector<1x8x16x4xf32> to vector<8x16x4xf32>
    %145 = vector.shape_cast %142 : vector<8x16x4xf32> to vector<1x8x16x4xf32>
    tpu.vector_store %arg9[%c0_59, %c0_60, %c0_61, %c0_62], %145 {strides = array<i32>} : memref<1x8x16x4xf32, #tpu.memory_space<vmem>>, vector<1x8x16x4xf32>,
    return
  }
  func.func @transform_0(%arg0: i32, %arg1: i32) -> (i32, i32, i32, i32) {
    %c0_i32 = arith.constant 0 : i32
    %c0_i32_0 = arith.constant 0 : i32
    %c0_i32_1 = arith.constant 0 : i32
    %c0_i32_2 = arith.constant 0 : i32
    return %arg0, %c0_i32, %c0_i32_0, %c0_i32_1 : i32, i32, i32, i32
  }
  func.func @transform_1(%arg0: i32, %arg1: i32) -> (i32, i32) {
    %c0_i32 = arith.constant 0 : i32
    %c0_i32_0 = arith.constant 0 : i32
    %c0_i32_1 = arith.constant 0 : i32
    return %c0_i32, %c0_i32_0 : i32, i32
  }
  func.func @transform_2(%arg0: i32, %arg1: i32) -> (i32, i32) {
    %c0_i32 = arith.constant 0 : i32
    %c0_i32_0 = arith.constant 0 : i32
    %c0_i32_1 = arith.constant 0 : i32
    return %c0_i32, %c0_i32_0 : i32, i32
  }
  func.func @transform_3(%arg0: i32, %arg1: i32) -> (i32, i32, i32) {
    %c0_i32 = arith.constant 0 : i32
    %c0_i32_0 = arith.constant 0 : i32
    %c0_i32_1 = arith.constant 0 : i32
    %c0_i32_2 = arith.constant 0 : i32
    return %c0_i32, %c0_i32_0, %c0_i32_1 : i32, i32, i32
  }
  func.func @transform_4(%arg0: i32, %arg1: i32) -> (i32, i32) {
    %c0_i32 = arith.constant 0 : i32
    %c0_i32_0 = arith.constant 0 : i32
    %c0_i32_1 = arith.constant 0 : i32
    return %c0_i32, %c0_i32_0 : i32, i32
  }
  func.func @transform_5(%arg0: i32, %arg1: i32) -> (i32, i32) {
    %c0_i32 = arith.constant 0 : i32
    %c0_i32_0 = arith.constant 0 : i32
    %c0_i32_1 = arith.constant 0 : i32
    return %c0_i32, %c0_i32_0 : i32, i32
  }
  func.func @transform_6(%arg0: i32, %arg1: i32) -> (i32, i32) {
    %c0_i32 = arith.constant 0 : i32
    %c0_i32_0 = arith.constant 0 : i32
    %c0_i32_1 = arith.constant 0 : i32
    return %c0_i32, %c0_i32_0 : i32, i32
  }
  func.func @transform_7(%arg0: i32, %arg1: i32) -> (i32, i32, i32, i32) {
    %c0_i32 = arith.constant 0 : i32
    %c0_i32_0 = arith.constant 0 : i32
    %c0_i32_1 = arith.constant 0 : i32
    return %arg0, %arg1, %c0_i32, %c0_i32_0 : i32, i32, i32, i32
  }
}

</mosaic_0001>

<bundles_post_ra>
// kernel: tpu_custom_call.1
= control target key start
LH: loop header
LB: loop body
LE: loop exit
PB: predicated region body
PF: predicated region fallthrough
CT: control target
= control target key end

     0   :  { %s2114_s24 = smov 0   ;;  %s2116_s25 = smov 0   ;;  %s3082_s0 = inlined_call_operand.vmem [shape: f32[2,16,16,4], index: 0, kind: input, shape index: {}]   ;;  %s3083_s1 = inlined_call_operand.vmem [shape: f32[4,128], index: 1, kind: input, shape index: {}]   ;;  %s3084_s2 = inlined_call_operand.vmem [shape: f32[1,128], index: 2, kind: input, shape index: {}]   ;;  %s3085_s3 = inlined_call_operand.vmem [shape: f32[3,3,128], index: 3, kind: input, shape index: {}]   ;;  %s3086_s4 = inlined_call_operand.vmem [shape: f32[1,128], index: 4, kind: input, shape index: {}]   ;;  %s3087_s5 = inlined_call_operand.vmem [shape: f32[128,4], index: 5, kind: input, shape index: {}]   ;;  %s3088_s6 = inlined_call_operand.vmem [shape: f32[1,4], index: 6, kind: input, shape index: {}]   ;;  %s3089_s7 = inlined_call_operand.vmem [shape: f32[2,16,16,4], index: 7, kind: output, shape index: {}]  }
   0x1   :  { %s2118_s26 = smov 0   ;;  %s2120_s27 = smov 0  }
   0x2   :  { %s2122_s28 = smov 0  }
   0x3 LB: > { %s26_s29 = sadd.s32 1, %s2051_s26  ;;  %s29_s30 = sadd.s32 1, %s2055_s27  ;;  %s2059_s28 = sphi %s2122_s28, %s17_s28   ;;  %s2055_s27 = sphi %s2120_s27, %s3104_s27   ;;  %s2051_s26 = sphi %s2118_s26, %s3103_s26   ;;  %s2047_s25 = sphi %s2116_s25, %s3102_s25   ;;  %s2043_s24 = sphi %s2114_s24, %s3101_s24  }
   0x4   : > { %p27_p0 = scmp.ge.s32.totalorder %s26_s29, 2  ;;  %p1803_p1 = scmp.ge.s32.totalorder %s2059_s28, 1 }
   0x5   : > { %p251_p2 = scmp.lt.s32.totalorder %s2059_s28, 5 }
   0x6   : > { %s3106_s29 = smov (%p27_p0, %s26_s29), 0  ;;  %s3108_s30 = smov (!%p27_p0, %s29_s30), %s2055_s27 }
   0x7   : > { %p252_p3 = pnand %p1803_p1, %p251_p2  ;;  %p31_p4 = scmp.ge.s32.totalorder %s3108_s30, 2 }
   0x9   : > { %s3110_s30 = smov (%p31_p4, %s3108_s30), 0  ;;  %255 = sbr.rel (%p252_p3) target bundleno = 901 (0x385), region = 48 }
   0xe   : > { %p288_p5 = scmp.lt.s32.totalorder %s2047_s25, 1  ;;  %s2147_s8 = sshll.u32 %s2043_s24, 3  ;;  %v2061_v0 = vmov 0   ;;  %v2062_v17 = vmov 1   ;;  %v2063_v18 = vmov 2   ;;  %v2064_v19 = vmov 0.0  }
   0xf   : > { %2002 = vset.pattern.permute.xlu1 %v2061_v0  ;;  %2001 = vset.pattern.permute.xlu0 %v2061_v0  ;;  %p296_p6 = scmp.lt.s32.totalorder %s2147_s8, 15  ;;  %s306_s18 = sadd.s32 8, %s2147_s8  ;;  %309 = vst [vmem:[#allocation2] sm:$0xff] %v2064_v19  ;;  %310 = vst [vmem:[#allocation2 + $0x8] sm:$0xff] %v2064_v19  ;;  %v2065_v20 = vmov 3   ;;  %v437_v31 = vlaneseq }
  0x10   : > { %s3112_s25 = smov (!%p288_p5, %s2047_s25), 1  ;;  %s1826_s20 = sshll.u32 %s2043_s24, 7  ;;  %311 = vst [vmem:[#allocation2 + $0x10] sm:$0x3] %v2064_v19  ;;  %312 = vst [vmem:[#allocation2 + $0x18] sm:$0xff] %v2064_v19 }
  0x11   : > { %s297_s10 = scalar_select %p296_p6, %s2147_s8, 15  ;;  %313 = vst [vmem:[#allocation2 + $0x20] sm:$0xff] %v2064_v19  ;;  %336 = vst [vmem:[#allocation2 + $0xd8] sm:$0xff] %v2064_v19  ;;  %v2291_v34 = vshrl.u32 %v437_v31, 7  ;;  %v2306_v41 = vld [vmem:[%s3083_s1] sm:$0xf] }
  0x12   : > { %s1825_s11 = sshll.u32 %s3112_s25, 8  ;;  %s1808_s12 = sshll.u32 %s3112_s25, 5  ;;  %337 = vst [vmem:[#allocation2 + $0xe0] sm:$0xff] %v2064_v19  ;;  %338 = vst [vmem:[#allocation2 + $0xe8] sm:$0x3] %v2064_v19 }
  0x13   : > { %s2155_s15 = scalar_lea.vmem %s3082_s0, %s1825_s11  ;;  %s1807_s16 = sshll.u32 %s297_s10, 1  ;;  %314 = vst [vmem:[#allocation2 + $0x28] sm:$0x3] %v2064_v19  ;;  %315 = vst [vmem:[#allocation2 + $0x30] sm:$0xff] %v2064_v19  ;;  %v2296_v37 = vsub.s32 1, %v2291_v34  ;;  %v2299_v38 = vsub.s32 0, %v2291_v34 }
  0x14   : > { %s300_s17 = sadd.s32 %s1808_s12, %s1807_s16  ;;  %s2165_s9 = scalar_lea.vmem %s2155_s15, %s1826_s20  ;;  %316 = vst [vmem:[#allocation2 + $0x38] sm:$0xff] %v2064_v19  ;;  %317 = vst [vmem:[#allocation2 + $0x40] sm:$0x3] %v2064_v19 }
  0x15   : > { %s1809_s19 = sshll.u32 %s300_s17, 3  ;;  %v2168_v1 = vld [vmem:[%s2165_s9 + $0x10] sm:$0xff]  ;;  %v2171_v2 = vld [vmem:[%s2165_s9] sm:$0xff]  ;;  %v2176_v3 = vld [vmem:[%s2165_s9 + $0x18] sm:$0xff]  ;;  %318 = vst [vmem:[#allocation2 + $0x48] sm:$0xff] %v2064_v19  ;;  %v2310_v42 = vrot.slane %v2306_v41, %v2296_v37  ;;  %v2314_v43 = vrot.slane %v2306_v41, %v2299_v38  ;;  %s3093_s12 = sadd.s32 4294967295, %s2147_s8 }
  0x16   : > { %s2162_s23 = scalar_lea.vmem %s3089_s7, %s1809_s19  ;;  %369 = vperm.xlu1 %2002, %v2168_v1   ;;  %359 = vperm.xlu0 %2001, %v2171_v2   ;;  %v2179_v4 = vld [vmem:[%s2165_s9 + $0x8] sm:$0xff]  ;;  %v2187_v6 = vld [vmem:[%s2165_s9 + $0x20] sm:$0xff]  ;;  %v2192_v7 = vld [vmem:[%s2165_s9 + $0x38] sm:$0xff]  ;;  %319 = vst [vmem:[#allocation2 + $0x50] sm:$0xff] %v2064_v19  ;;  %p1814_p7 = scmp.lt.s32.totalorder %s3093_s12, 0 }
  0x17   : > { %v2184_v5 = vld [vmem:[%s2165_s9 + $0x28] sm:$0xff]  ;;  %v2195_v8 = vld [vmem:[%s2165_s9 + $0x30] sm:$0xff]  ;;  %v2203_v10 = vld [vmem:[%s2165_s9 + $0x40] sm:$0xff]  ;;  %320 = vst [vmem:[#allocation2 + $0x58] sm:$0x3] %v2064_v19  ;;  %s3094_s13 = sadd.s32 (!%p1814_p7), 4294967295, %s2147_s8 }
  0x18   : > { %v2200_v9 = vld [vmem:[%s2165_s9 + $0x48] sm:$0xff]  ;;  %v2208_v11 = vld [vmem:[%s2165_s9 + $0x58] sm:$0xff]  ;;  %v2211_v12 = vld [vmem:[%s2165_s9 + $0x50] sm:$0xff]  ;;  %321 = vst [vmem:[#allocation2 + $0x60] sm:$0xff] %v2064_v19  ;;  %s1815_s14 = sshll.u32 (!%p1814_p7), %s3094_s13, 4 }
  0x19   : > { %v2216_v13 = vld [vmem:[%s2165_s9 + $0x68] sm:$0xff]  ;;  %v2219_v14 = vld [vmem:[%s2165_s9 + $0x60] sm:$0xff]  ;;  %v2224_v15 = vld [vmem:[%s2165_s9 + $0x78] sm:$0xff]  ;;  %322 = vst [vmem:[#allocation2 + $0x68] sm:$0xff] %v2064_v19  ;;  %s833_s16 = scalar_lea.vmem (!%p1814_p7), %s2155_s15, %s1815_s14 }
  0x1a   : > { %374 = vperm.xlu1 %2002, %v2176_v3   ;;  %364 = vperm.xlu0 %2001, %v2179_v4   ;;  %v2227_v16 = vld [vmem:[%s2165_s9 + $0x70] sm:$0xff]  ;;  %323 = vst [vmem:[#allocation2 + $0x70] sm:$0x3] %v2064_v19  ;;  %324 = vst [vmem:[#allocation2 + $0x78] sm:$0xff] %v2064_v19 }
  0x1b   : > { %325 = vst [vmem:[#allocation2 + $0x80] sm:$0xff] %v2064_v19  ;;  %326 = vst [vmem:[#allocation2 + $0x88] sm:$0x3] %v2064_v19 }
  0x1c   : > { %327 = vst [vmem:[#allocation2 + $0x90] sm:$0xff] %v2064_v19  ;;  %328 = vst [vmem:[#allocation2 + $0x98] sm:$0xff] %v2064_v19 }
  0x1d   : > { %329 = vst [vmem:[#allocation2 + $0xa0] sm:$0x3] %v2064_v19  ;;  %330 = vst [vmem:[#allocation2 + $0xa8] sm:$0xff] %v2064_v19 }
  0x1e   : > { %384 = vperm.xlu1 %2002, %v2184_v5   ;;  %379 = vperm.xlu0 %2001, %v2187_v6   ;;  %331 = vst [vmem:[#allocation2 + $0xb0] sm:$0xff] %v2064_v19  ;;  %332 = vst [vmem:[#allocation2 + $0xb8] sm:$0x3] %v2064_v19 }
  0x1f   : > { %333 = vst [vmem:[#allocation2 + $0xc0] sm:$0xff] %v2064_v19  ;;  %334 = vst [vmem:[#allocation2 + $0xc8] sm:$0xff] %v2064_v19 }
  0x20   : > { %335 = vst [vmem:[#allocation2 + $0xd0] sm:$0x3] %v2064_v19 }
  0x22   : > { %394 = vperm.xlu1 %2002, %v2192_v7   ;;  %389 = vperm.xlu0 %2001, %v2195_v8  }
  0x26   : > { %404 = vperm.xlu1 %2002, %v2200_v9   ;;  %399 = vperm.xlu0 %2001, %v2203_v10  }
  0x2a   : > { %414 = vperm.xlu1 %2002, %v2208_v11   ;;  %409 = vperm.xlu0 %2001, %v2211_v12  }
  0x2e   : > { %424 = vperm.xlu1 %2002, %v2216_v13   ;;  %419 = vperm.xlu0 %2001, %v2219_v14  }
  0x32   : > { %434 = vperm.xlu1 %2002, %v2224_v15   ;;  %429 = vperm.xlu0 %2001, %v2227_v16  }
  0x36   : > { %2004 = vset.pattern.permute.xlu1 %v2062_v17  ;;  %2003 = vset.pattern.permute.xlu0 %v2062_v17 }
  0x37   : > { %462 = vperm.xlu1 %2004, %v2179_v4   ;;  %458 = vperm.xlu0 %2003, %v2171_v2  }
  0x3b   : > { %466 = vperm.xlu1 %2004, %v2168_v1   ;;  %470 = vperm.xlu0 %2003, %v2176_v3  }
  0x3f   : > { %474 = vperm.xlu1 %2004, %v2187_v6   ;;  %478 = vperm.xlu0 %2003, %v2184_v5  }
  0x43   : > { %482 = vperm.xlu1 %2004, %v2195_v8   ;;  %486 = vperm.xlu0 %2003, %v2192_v7  }
  0x47   : > { %490 = vperm.xlu1 %2004, %v2203_v10   ;;  %494 = vperm.xlu0 %2003, %v2200_v9  }
  0x4b   : > { %498 = vperm.xlu1 %2004, %v2211_v12   ;;  %502 = vperm.xlu0 %2003, %v2208_v11  }
  0x4f   : > { %506 = vperm.xlu1 %2004, %v2219_v14   ;;  %510 = vperm.xlu0 %2003, %v2216_v13  }
  0x53   : > { %514 = vperm.xlu1 %2004, %v2227_v16   ;;  %518 = vperm.xlu0 %2003, %v2224_v15  }
  0x57   : > { %2005 = vset.pattern.permute.xlu1 %v2063_v18  ;;  %2006 = vset.pattern.permute.xlu0 %v2063_v18 }
  0x58   : > { %558 = vperm.xlu1 %2005, %v2171_v2   ;;  %562 = vperm.xlu0 %2006, %v2179_v4  }
  0x5c   : > { %566 = vperm.xlu1 %2005, %v2168_v1   ;;  %574 = vperm.xlu0 %2006, %v2187_v6  }
  0x60   : > { %570 = vperm.xlu1 %2005, %v2176_v3   ;;  %582 = vperm.xlu0 %2006, %v2195_v8  }
  0x64   : > { %578 = vperm.xlu1 %2005, %v2184_v5   ;;  %590 = vperm.xlu0 %2006, %v2203_v10  }
  0x68   : > { %586 = vperm.xlu1 %2005, %v2192_v7   ;;  %598 = vperm.xlu0 %2006, %v2211_v12  }
  0x6c   : > { %594 = vperm.xlu1 %2005, %v2200_v9   ;;  %606 = vperm.xlu0 %2006, %v2219_v14  }
  0x70   : > { %602 = vperm.xlu1 %2005, %v2208_v11   ;;  %614 = vperm.xlu0 %2006, %v2227_v16  }
  0x74   : > { %610 = vperm.xlu1 %2005, %v2216_v13   ;;  %2007 = vset.pattern.permute.xlu0 %v2065_v20 }
  0x75   : > { %658 = vperm.xlu0 %2007, %v2171_v2  }
  0x78   : > { %618 = vperm.xlu1 %2005, %v2224_v15  }
  0x79   : > { %670 = vperm.xlu0 %2007, %v2176_v3  }
  0x7c   : > { %2008 = vset.pattern.permute.xlu1 %v2065_v20 }
  0x7d   : > { %662 = vperm.xlu1 %2008, %v2179_v4   ;;  %678 = vperm.xlu0 %2007, %v2184_v5  }
  0x81   : > { %666 = vperm.xlu1 %2008, %v2168_v1   ;;  %686 = vperm.xlu0 %2007, %v2192_v7  }
  0x85   : > { %674 = vperm.xlu1 %2008, %v2187_v6   ;;  %694 = vperm.xlu0 %2007, %v2200_v9  }
  0x89   : > { %682 = vperm.xlu1 %2008, %v2195_v8   ;;  %702 = vperm.xlu0 %2007, %v2208_v11  }
  0x8d   : > { %690 = vperm.xlu1 %2008, %v2203_v10   ;;  %710 = vperm.xlu0 %2007, %v2216_v13  }
  0x91   : > { %v370_v21 = vpop.permute.xlu1 %369  ;;  %698 = vperm.xlu1 %2008, %v2211_v12   ;;  %718 = vperm.xlu0 %2007, %v2224_v15   ;;  %v2277_v22 = vpop.permute.xlu0 %359 }
  0x92   : > { %v443_v51 = vmul.f32 %v2314_v43, %v370_v21 }
  0x95   : > { %v2279_v23 = vpop.permute.xlu1 %374  ;;  %706 = vperm.xlu1 %2008, %v2219_v14   ;;  %v365_v24 = vpop.permute.xlu0 %364 }
  0x96   : > { %v442_v46 = vmul.f32 %v2314_v43, %v365_v24 }
  0x99   : > { %v2282_v25 = vpop.permute.xlu1 %384  ;;  %714 = vperm.xlu1 %2008, %v2227_v16   ;;  %v380_v26 = vpop.permute.xlu0 %379 }
  0x9a   : > { %v445_v56 = vmul.f32 %v2314_v43, %v380_v26 }
  0x9d   : > { %v2285_v27 = vpop.permute.xlu1 %394  ;;  %v390_v28 = vpop.permute.xlu0 %389 }
  0x9e   : > { %v447_v61 = vmul.f32 %v2314_v43, %v390_v28 }
  0xa1   : > { %v2287_v29 = vpop.permute.xlu1 %404  ;;  %v400_v30 = vpop.permute.xlu0 %399 }
  0xa2   : > { %v449_v2 = vmul.f32 %v2314_v43, %v400_v30 }
  0xa5   : > { %v2289_v32 = vpop.permute.xlu1 %414  ;;  %v410_v33 = vpop.permute.xlu0 %409 }
  0xa6   : > { %v451_v7 = vmul.f32 %v2314_v43, %v410_v33 }
  0xa9   : > { %v2293_v35 = vpop.permute.xlu1 %424  ;;  %v420_v36 = vpop.permute.xlu0 %419 }
  0xaa   : > { %v453_v12 = vmul.f32 %v2314_v43, %v420_v36 }
  0xad   : > { %v2301_v39 = vpop.permute.xlu1 %434  ;;  %v430_v40 = vpop.permute.xlu0 %429 }
  0xae   : > { %v455_v17 = vmul.f32 %v2314_v43, %v430_v40  ;;  %v2367_v40 = vsub.s32 2, %v2291_v34 }
  0xb2   : > { %v463_v44 = vpop.permute.xlu1 %462  ;;  %v459_v45 = vpop.permute.xlu0 %458 }
  0xb3   : > { %v526_v47 = vmul.f32 %v2310_v42, %v463_v44 }
  0xb5   : > { %v2318_v48 = vadd.f32 %v526_v47, %v442_v46 }
  0xb6   : > { %v467_v49 = vpop.permute.xlu1 %466  ;;  %v471_v50 = vpop.permute.xlu0 %470 }
  0xb7   : > { %v527_v52 = vmul.f32 %v2310_v42, %v467_v49  ;;  %v2375_v49 = vrot.slane %v2306_v41, %v2367_v40 }
  0xb9   : > { %v2322_v53 = vadd.f32 %v527_v52, %v443_v51  ;;  %v723_v51 = vsub.s32 3, %v2291_v34  ;;  %v525_v52 = vmul.f32 %v2310_v42, %v459_v45  ;;  %v444_v45 = vmul.f32 %v2314_v43, %v2279_v23 }
  0xba   : > { %v475_v54 = vpop.permute.xlu1 %474  ;;  %v479_v55 = vpop.permute.xlu0 %478 }
  0xbb   : > { %v529_v57 = vmul.f32 %v2310_v42, %v475_v54 }
  0xbd   : > { %v2326_v58 = vadd.f32 %v529_v57, %v445_v56  ;;  %v441_v57 = vmul.f32 %v2314_v43, %v2277_v22  ;;  %v530_v22 = vmul.f32 %v2310_v42, %v479_v55 }
  0xbe   : > { %v483_v59 = vpop.permute.xlu1 %482  ;;  %v2328_v60 = vpop.permute.xlu0 %486 }
  0xbf   : > { %v531_v62 = vmul.f32 %v2310_v42, %v483_v59 }
  0xc1   : > { %v2332_v63 = vadd.f32 %v531_v62, %v447_v61  ;;  %v2387_v61 = vrot.slane %v2306_v41, %v723_v51  ;;  %v541_v62 = vadd.f32 %v525_v52, %v441_v57  ;;  %v2400_v41 = vld [vmem:[%s3084_s2] ss:$0 sm:$0xff]  ;;  %v532_v52 = vmul.f32 %v2310_v42, %v2328_v60 }
  0xc2   : > { %v491_v0 = vpop.permute.xlu1 %490  ;;  %v2334_v1 = vpop.permute.xlu0 %494  ;;  %v450_v60 = vmul.f32 %v2314_v43, %v2287_v29 }
  0xc3   : > { %v533_v3 = vmul.f32 %v2310_v42, %v491_v0  ;;  %v528_v0 = vmul.f32 %v2310_v42, %v471_v50 }
  0xc5   : > { %v2338_v4 = vadd.f32 %v533_v3, %v449_v2 }
  0xc6   : > { %v499_v5 = vpop.permute.xlu1 %498  ;;  %v2340_v6 = vpop.permute.xlu0 %502 }
  0xc7   : > { %v535_v8 = vmul.f32 %v2310_v42, %v499_v5 }
  0xc9   : > { %v2344_v9 = vadd.f32 %v535_v8, %v451_v7  ;;  %v544_v8 = vadd.f32 %v528_v0, %v444_v45 }
  0xca   : > { %v507_v10 = vpop.permute.xlu1 %506  ;;  %v2346_v11 = vpop.permute.xlu0 %510 }
  0xcb   : > { %v537_v13 = vmul.f32 %v2310_v42, %v507_v10 }
  0xcd   : > { %v2350_v14 = vadd.f32 %v537_v13, %v453_v12  ;;  %v446_v12 = vmul.f32 %v2314_v43, %v2282_v25 }
  0xce   : > { %v515_v15 = vpop.permute.xlu1 %514  ;;  %v2352_v16 = vpop.permute.xlu0 %518 }
  0xcf   : > { %v539_v18 = vmul.f32 %v2310_v42, %v515_v15 }
  0xd1   : > { %v2356_v19 = vadd.f32 %v539_v18, %v455_v17 }
  0xd3   : > { %v559_v20 = vpop.permute.xlu1 %558  ;;  %v563_v21 = vpop.permute.xlu0 %562 }
  0xd4   : > { %v625_v59 = vmul.f32 %v2375_v49, %v559_v20  ;;  %v626_v23 = vmul.f32 %v2375_v49, %v563_v21  ;;  %v546_v20 = vadd.f32 %v530_v22, %v446_v12  ;;  %v534_v12 = vmul.f32 %v2310_v42, %v2334_v1 }
  0xd6   : > { %v641_v3 = vadd.f32 %v625_v59, %v541_v62  ;;  %v642_v57 = vadd.f32 %v626_v23, %v2318_v48  ;;  %v452_v48 = vmul.f32 %v2314_v43, %v2289_v32 }
  0xd7   : > { %v567_v24 = vpop.permute.xlu1 %566  ;;  %v2358_v26 = vpop.permute.xlu0 %574 }
  0xd8   : > { %v627_v25 = vmul.f32 %v2375_v49, %v567_v24  ;;  %v629_v29 = vmul.f32 %v2375_v49, %v2358_v26 }
  0xdb   : > { %v571_v28 = vpop.permute.xlu1 %570  ;;  %v2360_v30 = vpop.permute.xlu0 %582 }
  0xdc   : > { %v628_v5 = vmul.f32 %v2375_v49, %v571_v28  ;;  %v631_v26 = vmul.f32 %v2375_v49, %v2360_v30 }
  0xde   : > { %v644_v17 = vadd.f32 %v628_v5, %v544_v8  ;;  %v454_v5 = vmul.f32 %v2314_v43, %v2293_v35 }
  0xdf   : > { %v579_v31 = vpop.permute.xlu1 %578  ;;  %v2362_v33 = vpop.permute.xlu0 %590 }
  0xe0   : > { %v630_v13 = vmul.f32 %v2375_v49, %v579_v31 }
  0xe2   : > { %v646_v59 = vadd.f32 %v630_v13, %v546_v20 }
  0xe3   : > { %v587_v36 = vpop.permute.xlu1 %586  ;;  %v2364_v44 = vpop.permute.xlu0 %598 }
  0xe4   : > { %v632_v24 = vmul.f32 %v2375_v49, %v587_v36 }
  0xe7   : > { %v2369_v46 = vpop.permute.xlu1 %594  ;;  %v2371_v47 = vpop.permute.xlu0 %606 }
  0xe8   : > { %v634_v1 = vmul.f32 %v2375_v49, %v2369_v46 }
  0xeb   : > { %v2379_v54 = vpop.permute.xlu1 %602  ;;  %v2381_v56 = vpop.permute.xlu0 %614 }
  0xef   : > { %v2390_v2 = vpop.permute.xlu1 %610 }
  0xf0   : > { %v659_v34 = vpop.permute.xlu0 %658 }
  0xf1   : > { %v725_v7 = vmul.f32 %v2387_v61, %v659_v34 }
  0xf3   : > { %v741_v50 = vadd.f32 %v725_v7, %v641_v3  ;;  %v2402_v10 = vpop.permute.xlu1 %618  ;;  %v448_v3 = vmul.f32 %v2314_v43, %v2285_v27  ;;  %v643_v27 = vadd.f32 %v627_v25, %v2322_v53 }
  0xf4   : > { %v671_v15 = vpop.permute.xlu0 %670 }
  0xf5   : > { %v763_v55 = vadd.f32 %v2400_v41, %v741_v50  ;;  %v728_v18 = vmul.f32 %v2387_v61, %v671_v15  ;;  %v548_v50 = vadd.f32 %v532_v52, %v448_v3  ;;  %v645_v52 = vadd.f32 %v629_v29, %v2326_v58 }
  0xf6   : > { %v538_v58 = vmul.f32 %v2310_v42, %v2346_v11 }
  0xf7   : > { %v779_v28 = vmax.f32 %v763_v55, 0.0  ;;  %v744_v51 = vadd.f32 %v728_v18, %v644_v17  ;;  %v536_v17 = vmul.f32 %v2310_v42, %v2340_v6  ;;  %v648_v55 = vadd.f32 %v632_v24, %v548_v50 }
  0xf8   : > { %v663_v21 = vpop.permute.xlu1 %662  ;;  %v679_v62 = vpop.permute.xlu0 %678  ;;  %v633_v24 = vmul.f32 %v2375_v49, %v2362_v33 }
  0xf9   : > { %v795_v31 = vmin.f32 %v779_v28, 6.0  ;;  %v766_v0 = vadd.f32 %v2400_v41, %v744_v51  ;;  %v726_v34 = vmul.f32 %v2387_v61, %v663_v21  ;;  %v730_v45 = vmul.f32 %v2387_v61, %v679_v62 }
  0xfa   : > { %v550_v51 = vadd.f32 %v534_v12, %v450_v60  ;;  %v552_v30 = vadd.f32 %v536_v17, %v452_v48  ;;  %v540_v17 = vmul.f32 %v2310_v42, %v2352_v16  ;;  %v640_v16 = vmul.f32 %v2375_v49, %v2402_v10 }
  0xfb   : > { %812 = vst [vmem:[#allocation2 + $0x19] sm:$0xff] %v795_v31  ;;  %v782_v7 = vmax.f32 %v766_v0, 0.0  ;;  %v742_v22 = vadd.f32 %v726_v34, %v642_v57  ;;  %v746_v8 = vadd.f32 %v730_v45, %v646_v59  ;;  %v636_v57 = vmul.f32 %v2375_v49, %v2379_v54 }
  0xfc   : > { %v667_v23 = vpop.permute.xlu1 %666  ;;  %v687_v32 = vpop.permute.xlu0 %686  ;;  %v650_v0 = vadd.f32 %v634_v1, %v550_v51  ;;  %v647_v54 = vadd.f32 %v631_v26, %v2332_v63  ;;  %v456_v63 = vmul.f32 %v2314_v43, %v2301_v39  ;;  %v635_v1 = vmul.f32 %v2375_v49, %v2364_v44 }
  0xfd   : > { %v798_v13 = vmin.f32 %v782_v7, 6.0  ;;  %v764_v36 = vadd.f32 %v2400_v41, %v742_v22  ;;  %v768_v35 = vadd.f32 %v2400_v41, %v746_v8  ;;  %v727_v15 = vmul.f32 %v2387_v61, %v667_v23 }
  0xfe   : > { %v732_v53 = vmul.f32 %v2387_v61, %v687_v32  ;;  %v652_v7 = vadd.f32 %v636_v57, %v552_v30  ;;  %v638_v23 = vmul.f32 %v2375_v49, %v2390_v2 }
  0xff   : > { %815 = vst [vmem:[#allocation2 + $0x39] sm:$0xff] %v798_v13  ;;  %v780_v18 = vmax.f32 %v764_v36, 0.0  ;;  %v784_v20 = vmax.f32 %v768_v35, 0.0  ;;  %v743_v28 = vadd.f32 %v727_v15, %v643_v27  ;;  %v554_v13 = vadd.f32 %v538_v58, %v454_v5 }
 0x100   : > { %v748_v6 = vadd.f32 %v732_v53, %v648_v55  ;;  %v675_v25 = vpop.permute.xlu1 %674  ;;  %v695_v59 = vpop.permute.xlu0 %694  ;;  %v649_v55 = vadd.f32 %v633_v24, %v2338_v4 }
 0x101   : > { %v796_v21 = vmin.f32 %v780_v18, 6.0  ;;  %v800_v46 = vmin.f32 %v784_v20, 6.0  ;;  %v765_v62 = vadd.f32 %v2400_v41, %v743_v28  ;;  %v729_v31 = vmul.f32 %v2387_v61, %v675_v25 }
 0x102   : > { %v770_v34 = vadd.f32 %v2400_v41, %v748_v6  ;;  %v734_v45 = vmul.f32 %v2387_v61, %v695_v59  ;;  %v654_v28 = vadd.f32 %v638_v23, %v554_v13  ;;  %v556_v6 = vadd.f32 %v540_v17, %v456_v63 }
 0x103   : > { %813 = vst [vmem:[#allocation2 + $0x21] sm:$0xff] %v796_v21  ;;  %817 = vst [vmem:[#allocation2 + $0x51] sm:$0xff] %v800_v46  ;;  %v781_v3 = vmax.f32 %v765_v62, 0.0  ;;  %v745_v60 = vadd.f32 %v729_v31, %v645_v52  ;;  %v651_v25 = vadd.f32 %v635_v1, %v2344_v9  ;;  %v637_v59 = vmul.f32 %v2375_v49, %v2371_v47 }
 0x104   : > { %v786_v22 = vmax.f32 %v770_v34, 0.0  ;;  %v750_v48 = vadd.f32 %v734_v45, %v650_v0  ;;  %v683_v8 = vpop.permute.xlu1 %682  ;;  %v703_v50 = vpop.permute.xlu0 %702  ;;  %v656_v34 = vadd.f32 %v640_v16, %v556_v6 }
 0x105   : > { %v797_v12 = vmin.f32 %v781_v3, 6.0  ;;  %v767_v27 = vadd.f32 %v2400_v41, %v745_v60  ;;  %v731_v29 = vmul.f32 %v2387_v61, %v683_v8  ;;  %v736_v11 = vmul.f32 %v2387_v61, %v703_v50 }
 0x106   : > { %v802_v32 = vmin.f32 %v786_v22, 6.0  ;;  %v772_v33 = vadd.f32 %v2400_v41, %v750_v48  ;;  %v653_v47 = vadd.f32 %v637_v59, %v2350_v14 }
 0x107   : > { %814 = vst [vmem:[#allocation2 + $0x31] sm:$0xff] %v797_v12  ;;  %v783_v36 = vmax.f32 %v767_v27, 0.0  ;;  %v747_v35 = vadd.f32 %v731_v29, %v647_v54  ;;  %v752_v15 = vadd.f32 %v736_v11, %v652_v7  ;;  %v639_v7 = vmul.f32 %v2375_v49, %v2381_v56 }
 0x108   : > { %819 = vst [vmem:[#allocation2 + $0x69] sm:$0xff] %v802_v32  ;;  %v788_v39 = vmax.f32 %v772_v33, 0.0  ;;  %v691_v53 = vpop.permute.xlu1 %690  ;;  %v711_v2 = vpop.permute.xlu0 %710 }
 0x109   : > { %v799_v26 = vmin.f32 %v783_v36, 6.0  ;;  %v769_v18 = vadd.f32 %v2400_v41, %v747_v35  ;;  %v774_v5 = vadd.f32 %v2400_v41, %v752_v15  ;;  %v733_v20 = vmul.f32 %v2387_v61, %v691_v53 }
 0x10a   : > { %v804_v51 = vmin.f32 %v788_v39, 6.0  ;;  %v738_v4 = vmul.f32 %v2387_v61, %v711_v2  ;;  %v655_v63 = vadd.f32 %v639_v7, %v2356_v19 }
 0x10b   : > { %816 = vst [vmem:[#allocation2 + $0x49] sm:$0xff] %v799_v26  ;;  %v785_v44 = vmax.f32 %v769_v18, 0.0  ;;  %v790_v52 = vmax.f32 %v774_v5, 0.0  ;;  %v749_v57 = vadd.f32 %v733_v20, %v649_v55 }
 0x10c   : > { %821 = vst [vmem:[#allocation2 + $0x81] sm:$0xff] %v804_v51  ;;  %v754_v21 = vadd.f32 %v738_v4, %v654_v28  ;;  %v699_v46 = vpop.permute.xlu1 %698  ;;  %v719_v62 = vpop.permute.xlu0 %718 }
 0x10d   : > { %v801_v31 = vmin.f32 %v785_v44, 6.0  ;;  %v806_v30 = vmin.f32 %v790_v52, 6.0  ;;  %v771_v10 = vadd.f32 %v2400_v41, %v749_v57  ;;  %v735_v0 = vmul.f32 %v2387_v61, %v699_v46 }
 0x10e   : > { %v776_v45 = vadd.f32 %v2400_v41, %v754_v21  ;;  %v740_v58 = vmul.f32 %v2387_v61, %v719_v62 }
 0x10f   : > { %818 = vst [vmem:[#allocation2 + $0x61] sm:$0xff] %v801_v31  ;;  %823 = vst [vmem:[#allocation2 + $0x99] sm:$0xff] %v806_v30  ;;  %v787_v9 = vmax.f32 %v771_v10, 0.0  ;;  %v751_v54 = vadd.f32 %v735_v0, %v651_v25 }
 0x110   : > { %v792_v3 = vmax.f32 %v776_v45, 0.0  ;;  %v756_v60 = vadd.f32 %v740_v58, %v656_v34  ;;  %v707_v24 = vpop.permute.xlu1 %706 }
 0x111   : > { %v803_v22 = vmin.f32 %v787_v9, 6.0  ;;  %v773_v48 = vadd.f32 %v2400_v41, %v751_v54  ;;  %v737_v8 = vmul.f32 %v2387_v61, %v707_v24 }
 0x112   : > { %v808_v50 = vmin.f32 %v792_v3, 6.0  ;;  %v778_v12 = vadd.f32 %v2400_v41, %v756_v60 }
 0x113   : > { %820 = vst [vmem:[#allocation2 + $0x79] sm:$0xff] %v803_v22  ;;  %v789_v27 = vmax.f32 %v773_v48, 0.0  ;;  %v753_v29 = vadd.f32 %v737_v8, %v653_v47 }
 0x114   : > { %825 = vst [vmem:[#allocation2 + $0xb1] sm:$0xff] %v808_v50  ;;  %v794_v11 = vmax.f32 %v778_v12, 0.0  ;;  %v715_v14 = vpop.permute.xlu1 %714 }
 0x115   : > { %v805_v23 = vmin.f32 %v789_v27, 6.0  ;;  %v775_v32 = vadd.f32 %v2400_v41, %v753_v29  ;;  %v739_v56 = vmul.f32 %v2387_v61, %v715_v14 }
 0x116   : > { %v810_v33 = vmin.f32 %v794_v11, 6.0 }
 0x117   : > { %822 = vst [vmem:[#allocation2 + $0x91] sm:$0xff] %v805_v23  ;;  %v791_v13 = vmax.f32 %v775_v32, 0.0  ;;  %v755_v36 = vadd.f32 %v739_v56, %v655_v63 }
 0x118   : > { %827 = vst [vmem:[#allocation2 + $0xc9] sm:$0xff] %v810_v33 }
 0x119   : > { %v807_v35 = vmin.f32 %v791_v13, 6.0  ;;  %v777_v15 = vadd.f32 %v2400_v41, %v755_v36 }
 0x11b   : > { %824 = vst [vmem:[#allocation2 + $0xa9] sm:$0xff] %v807_v35  ;;  %v793_v17 = vmax.f32 %v777_v15, 0.0  ;;  %831 = sbr.rel (%p1814_p7) target bundleno = 439 (0x1b7), region = 52 }
 0x11d   : > { %v809_v55 = vmin.f32 %v793_v17, 6.0 }
 0x11f   : > { %826 = vst [vmem:[#allocation2 + $0xc1] sm:$0xff] %v809_v55 }
 0x120   : > { %v2066_v19 = vmov 1   ;;  %v2067_v1 = vmov 0   ;;  %v834_v39 = vld [vmem:[%s833_s16] sm:$0xff]  ;;  %v835_v53 = vld [vmem:[%s833_s16 + $0x8] sm:$0xff]  ;;  %v2068_v2 = vmov 2   ;;  %v2069_v26 = vmov 3  }
 0x121   : > { %2010 = vset.pattern.permute.xlu1 %v2066_v19  ;;  %2009 = vset.pattern.permute.xlu0 %v2067_v1 }
 0x122   : > { %849 = vperm.xlu1 %2010, %v834_v39   ;;  %838 = vperm.xlu0 %2009, %v834_v39  }
 0x126   : > { %853 = vperm.xlu1 %2010, %v835_v53   ;;  %843 = vperm.xlu0 %2009, %v835_v53  }
 0x12a   : > { %2012 = vset.pattern.permute.xlu1 %v2068_v2  ;;  %2011 = vset.pattern.permute.xlu0 %v2068_v2 }
 0x12b   : > { %865 = vperm.xlu1 %2012, %v835_v53   ;;  %861 = vperm.xlu0 %2011, %v834_v39  }
 0x12f   : > { %2013 = vset.pattern.permute.xlu1 %v2069_v26  ;;  %2014 = vset.pattern.permute.xlu0 %v2069_v26 }
 0x130   : > { %873 = vperm.xlu1 %2013, %v834_v39   ;;  %877 = vperm.xlu0 %2014, %v835_v53  }
 0x19d   : > { %v850_v18 = vpop.permute.xlu1 %849  ;;  %v839_v5 = vpop.permute.xlu0 %838 }
 0x19e   : > { %v856_v16 = vmul.f32 %v850_v18, %v2310_v42  ;;  %v846_v51 = vmul.f32 %v839_v5, %v2314_v43 }
 0x1a0   : > { %v858_v59 = vadd.f32 %v856_v16, %v846_v51 }
 0x1a1   : > { %v854_v20 = vpop.permute.xlu1 %853  ;;  %v844_v28 = vpop.permute.xlu0 %843 }
 0x1a2   : > { %v857_v4 = vmul.f32 %v854_v20, %v2310_v42  ;;  %v847_v44 = vmul.f32 %v844_v28, %v2314_v43 }
 0x1a4   : > { %v859_v21 = vadd.f32 %v857_v4, %v847_v44 }
 0x1a6   : > { %v866_v52 = vpop.permute.xlu1 %865  ;;  %v862_v57 = vpop.permute.xlu0 %861 }
 0x1a7   : > { %v869_v6 = vmul.f32 %v866_v52, %v2375_v49  ;;  %v868_v25 = vmul.f32 %v862_v57, %v2375_v49 }
 0x1a9   : > { %v871_v31 = vadd.f32 %v869_v6, %v859_v21  ;;  %v870_v30 = vadd.f32 %v868_v25, %v858_v59 }
 0x1ab   : > { %v874_v46 = vpop.permute.xlu1 %873  ;;  %v878_v62 = vpop.permute.xlu0 %877 }
 0x1ac   : > { %v880_v10 = vmul.f32 %v874_v46, %v2387_v61  ;;  %v881_v0 = vmul.f32 %v878_v62, %v2387_v61 }
 0x1ae   : > { %v882_v34 = vadd.f32 %v880_v10, %v870_v30  ;;  %v883_v45 = vadd.f32 %v881_v0, %v871_v31 }
 0x1b0   : > { %v884_v58 = vadd.f32 %v2400_v41, %v882_v34  ;;  %v885_v9 = vadd.f32 %v2400_v41, %v883_v45 }
 0x1b2   : > { %v886_v54 = vmax.f32 %v884_v58, 0.0  ;;  %v887_v47 = vmax.f32 %v885_v9, 0.0 }
 0x1b4   : > { %v888_v3 = vmin.f32 %v886_v54, 6.0  ;;  %v889_v60 = vmin.f32 %v887_v47, 6.0 }
 0x1b6   : > { %890 = vst [vmem:[#allocation2 + $0x1] sm:$0xff] %v888_v3  ;;  %891 = vst [vmem:[#allocation2 + $0x9] sm:$0xff] %v889_v60 }
 0x1b7 PF: > { %p1816_p8 = scmp.gt.s32.totalorder %s306_s18, 15 }
 0x1b9   : > { %895 = sbr.rel (%p1816_p8) target bundleno = 597 (0x255), region = 56 }
 0x1be   : > { %v1819_v24 = vld [vmem:[%s2165_s9 + $0x80] sm:$0xff]  ;;  %v2070_v7 = vmov 1   ;;  %v2071_v22 = vmov 0   ;;  %v1820_v48 = vld [vmem:[%s2165_s9 + $0x88] sm:$0xff]  ;;  %v2072_v8 = vmov 2   ;;  %v2073_v50 = vmov 3  }
 0x1bf   : > { %2016 = vset.pattern.permute.xlu1 %v2070_v7  ;;  %2015 = vset.pattern.permute.xlu0 %v2071_v22 }
 0x1c0   : > { %913 = vperm.xlu1 %2016, %v1819_v24   ;;  %902 = vperm.xlu0 %2015, %v1819_v24  }
 0x1c4   : > { %917 = vperm.xlu1 %2016, %v1820_v48   ;;  %907 = vperm.xlu0 %2015, %v1820_v48  }
 0x1c8   : > { %2018 = vset.pattern.permute.xlu1 %v2072_v8  ;;  %2017 = vset.pattern.permute.xlu0 %v2072_v8 }
 0x1c9   : > { %929 = vperm.xlu1 %2018, %v1820_v48   ;;  %925 = vperm.xlu0 %2017, %v1819_v24  }
 0x1cd   : > { %2019 = vset.pattern.permute.xlu1 %v2073_v50  ;;  %2020 = vset.pattern.permute.xlu0 %v2073_v50 }
 0x1ce   : > { %937 = vperm.xlu1 %2019, %v1819_v24   ;;  %941 = vperm.xlu0 %2020, %v1820_v48  }
 0x23b   : > { %v914_v12 = vpop.permute.xlu1 %913  ;;  %v903_v27 = vpop.permute.xlu0 %902 }
 0x23c   : > { %v920_v14 = vmul.f32 %v914_v12, %v2310_v42  ;;  %v910_v63 = vmul.f32 %v903_v27, %v2314_v43 }
 0x23e   : > { %v922_v35 = vadd.f32 %v920_v14, %v910_v63 }
 0x23f   : > { %v918_v29 = vpop.permute.xlu1 %917  ;;  %v908_v11 = vpop.permute.xlu0 %907 }
 0x240   : > { %v921_v23 = vmul.f32 %v918_v29, %v2310_v42  ;;  %v911_v32 = vmul.f32 %v908_v11, %v2314_v43 }
 0x242   : > { %v923_v15 = vadd.f32 %v921_v23, %v911_v32 }
 0x244   : > { %v930_v56 = vpop.permute.xlu1 %929  ;;  %v926_v33 = vpop.permute.xlu0 %925 }
 0x245   : > { %v933_v13 = vmul.f32 %v930_v56, %v2375_v49  ;;  %v932_v36 = vmul.f32 %v926_v33, %v2375_v49 }
 0x247   : > { %v935_v19 = vadd.f32 %v933_v13, %v923_v15  ;;  %v934_v1 = vadd.f32 %v932_v36, %v922_v35 }
 0x249   : > { %v938_v17 = vpop.permute.xlu1 %937  ;;  %v942_v55 = vpop.permute.xlu0 %941 }
 0x24a   : > { %v944_v39 = vmul.f32 %v938_v17, %v2387_v61  ;;  %v945_v53 = vmul.f32 %v942_v55, %v2387_v61 }
 0x24c   : > { %v946_v2 = vadd.f32 %v944_v39, %v934_v1  ;;  %v947_v42 = vadd.f32 %v945_v53, %v935_v19 }
 0x24e   : > { %v948_v43 = vadd.f32 %v2400_v41, %v946_v2  ;;  %v949_v26 = vadd.f32 %v2400_v41, %v947_v42 }
 0x250   : > { %v950_v18 = vmax.f32 %v948_v43, 0.0  ;;  %v951_v5 = vmax.f32 %v949_v26, 0.0 }
 0x252   : > { %v952_v20 = vmin.f32 %v950_v18, 6.0  ;;  %v953_v49 = vmin.f32 %v951_v5, 6.0 }
 0x254   : > { %955 = vst [vmem:[#allocation2 + $0xd9] sm:$0xff] %v952_v20  ;;  %956 = vst [vmem:[#allocation2 + $0xe1] sm:$0xff] %v953_v49 }
 0x255 PF: > { %v1499_v28 = vld [vmem:[%s3087_s5 + $0x78] sm:$0xff]  ;;  %v1498_v61 = vld [vmem:[%s3087_s5 + $0x70] sm:$0xff]  ;;  %v1497_v41 = vld [vmem:[%s3087_s5 + $0x68] sm:$0xff]  ;;  %vm1684_vm0 = vcmask 31744  }
 0x256   : > { %1860 = vmatprep.subr.mxu0 %v1499_v28  ;;  %1916 = vmatprep.subr.mxu1 %v1499_v28  ;;  %v1496_v16 = vld [vmem:[%s3087_s5 + $0x60] sm:$0xff]  ;;  %v1495_v44 = vld [vmem:[%s3087_s5 + $0x58] sm:$0xff]  ;;  %v959_v21 = vld [vmem:[%s3085_s3 + $0x8] sm:$0x7] }
 0x257   : > { %1861 = vmatpush3.msra.mxu0 %v1499_v28  ;;  %1932 = vmatpush3.msra.mxu1 %v1499_v28  ;;  %v957_v51 = vld [vmem:[%s3085_s3] sm:$0x7]  ;;  %v958_v4 = vld [vmem:[%s3085_s3 + $0x4] sm:$0x7]  ;;  %v2551_v62 = vld [vmem:[#allocation2 + $0x18] sm:$0xff]  ;;  %v2576_v60 = vrot.slane %v959_v21, %v2299_v38  ;;  %v2579_v24 = vrot.slane %v959_v21, %v2296_v37  ;;  %v2590_v50 = vrot.slane %v959_v21, %v2367_v40 }
 0x258   : > { %1862 = vmatprep.subr.mxu0 %v1498_v61  ;;  %1917 = vmatprep.subr.mxu1 %v1498_v61  ;;  %v960_v52 = vld [vmem:[#allocation2] sm:$0xff]  ;;  %v2540_v57 = vrot.slane %v957_v51, %v2299_v38  ;;  %v2543_v25 = vrot.slane %v957_v51, %v2296_v37  ;;  %v2546_v59 = vrot.slane %v957_v51, %v2367_v40  ;;  %v1494_v0 = vld [vmem:[%s3087_s5 + $0x50] sm:$0xff]  ;;  %v1493_v47 = vld [vmem:[%s3087_s5 + $0x48] sm:$0xff] }
 0x259   : > { %1863 = vmatpush3.msra.mxu0 %v1498_v61  ;;  %1933 = vmatpush3.msra.mxu1 %v1498_v61  ;;  %v1012_v6 = vld [vmem:[#allocation2 + $0x1] sm:$0xff]  ;;  %v2554_v31 = vrot.slane %v958_v4, %v2299_v38  ;;  %v2557_v30 = vrot.slane %v958_v4, %v2296_v37  ;;  %v2560_v10 = vrot.slane %v958_v4, %v2367_v40  ;;  %v2585_v48 = vld [vmem:[#allocation2 + $0x19] sm:$0xff]  ;;  %v2605_v14 = vld [vmem:[#allocation2 + $0x30] sm:$0xff] }
 0x25a   : > { %1864 = vmatprep.subr.mxu0 %v1497_v41  ;;  %1918 = vmatprep.subr.mxu1 %v1497_v41  ;;  %v1064_v46 = vld [vmem:[#allocation2 + $0x2] sm:$0xff]  ;;  %v980_v34 = vmul.f32 %v2540_v57, %v960_v52  ;;  %v1032_v45 = vmul.f32 %v2543_v25, %v1012_v6  ;;  %v2587_v8 = vld [vmem:[#allocation2 + $0x1a] sm:$0xff]  ;;  %v1293_v23 = vmul.f32 %v2576_v60, %v2605_v14  ;;  %v2612_v32 = vld [vmem:[#allocation2 + $0x31] sm:$0xff] }
 0x25b   : > { %1865 = vmatpush3.msra.mxu0 %v1497_v41  ;;  %1934 = vmatpush3.msra.mxu1 %v1497_v41  ;;  %v1084_v58 = vmul.f32 %v2546_v59, %v1064_v46  ;;  %v1136_v9 = vmul.f32 %v2554_v31, %v2551_v62  ;;  %v2570_v54 = vld [vmem:[#allocation2 + $0x60] sm:$0xff]  ;;  %v2596_v12 = vld [vmem:[#allocation2 + $0x78] sm:$0xff]  ;;  %v1188_v11 = vmul.f32 %v2557_v30, %v2585_v48  ;;  %v961_v55 = vld [vmem:[#allocation2 + $0x8] sm:$0xff] }
 0x25c   : > { %1866 = vmatprep.subr.mxu0 %v1496_v16  ;;  %1919 = vmatprep.subr.mxu1 %v1496_v16  ;;  %v1048_v3 = vadd.f32 %v1032_v45, %v980_v34  ;;  %v2581_v7 = vld [vmem:[#allocation2 + $0x61] sm:$0xff]  ;;  %v988_v38 = vmul.f32 %v2540_v57, %v2570_v54  ;;  %v1240_v40 = vmul.f32 %v2560_v10, %v2587_v8  ;;  %v1491_v63 = vld [vmem:[%s3087_s5 + $0x38] sm:$0xff]  ;;  %v1013_v19 = vld [vmem:[#allocation2 + $0x9] sm:$0xff] }
 0x25d   : > { %1867 = vmatpush3.msra.mxu0 %v1496_v16  ;;  %1935 = vmatpush3.msra.mxu1 %v1496_v16  ;;  %v2583_v22 = vld [vmem:[#allocation2 + $0x62] sm:$0xff]  ;;  %v1040_v37 = vmul.f32 %v2543_v25, %v2581_v7  ;;  %v2614_v56 = vld [vmem:[#allocation2 + $0x32] sm:$0xff]  ;;  %v1345_v35 = vmul.f32 %v2579_v24, %v2612_v32  ;;  %v1144_v15 = vmul.f32 %v2554_v31, %v2596_v12  ;;  %v2630_v2 = vld [vmem:[#allocation2 + $0x7a] sm:$0xff] }
 0x25e   : > { %1868 = vmatprep.subr.mxu0 %v1495_v44  ;;  %1920 = vmatprep.subr.mxu1 %v1495_v44  ;;  %v1492_v27 = vld [vmem:[%s3087_s5 + $0x40] sm:$0xff]  ;;  %v1100_v29 = vadd.f32 %v1084_v58, %v1048_v3  ;;  %v1092_v13 = vmul.f32 %v2546_v59, %v2583_v22  ;;  %v2626_v1 = vmul.f32 %v2590_v50, %v2614_v56  ;;  %v2632_v42 = vld [vmem:[#allocation2 + $0x90] sm:$0xff]  ;;  %v1489_v51 = vld [vmem:[%s3087_s5 + $0x28] sm:$0xff] }
 0x25f   : > { %1869 = vmatpush3.msra.mxu0 %v1495_v44  ;;  %1936 = vmatpush3.msra.mxu1 %v1495_v44  ;;  %v1056_v33 = vadd.f32 %v1040_v37, %v988_v38  ;;  %v2622_v17 = vld [vmem:[#allocation2 + $0x79] sm:$0xff]  ;;  %3095 = vst [vmem:[#allocation3_spill] sm:$0xff] %v2630_v2  ;;  %v1065_v43 = vld [vmem:[#allocation2 + $0xa] sm:$0xff]  ;;  %v1248_v5 = vmul.f32 %v2560_v10, %v2630_v2  ;;  %v2657_v34 = vld [vmem:[#allocation2 + $0x21] sm:$0xff] }
 0x260   : > { %1870 = vmatprep.subr.mxu0 %v1494_v0  ;;  %1921 = vmatprep.subr.mxu1 %v1494_v0  ;;  %v1152_v36 = vadd.f32 %v1136_v9, %v1100_v29  ;;  %v1196_v53 = vmul.f32 %v2557_v30, %v2622_v17  ;;  %v1490_v26 = vld [vmem:[%s3087_s5 + $0x30] sm:$0xff]  ;;  %v1301_v20 = vmul.f32 %v2576_v60, %v2632_v42  ;;  %v2641_v49 = vld [vmem:[#allocation2 + $0x20] sm:$0xff]  ;;  %v2659_v45 = vld [vmem:[#allocation2 + $0x68] sm:$0xff] }
 0x261   : > { %1871 = vmatpush3.msra.mxu0 %v1494_v0  ;;  %1937 = vmatpush3.msra.mxu1 %v1494_v0  ;;  %v1108_v39 = vadd.f32 %v1092_v13, %v1056_v33  ;;  %v2643_v61 = vld [vmem:[#allocation2 + $0x91] sm:$0xff]  ;;  %v981_v41 = vmul.f32 %v2540_v57, %v961_v55  ;;  %v1033_v16 = vmul.f32 %v2543_v25, %v1013_v19  ;;  %v1488_v58 = vld [vmem:[%s3087_s5 + $0x20] sm:$0xff]  ;;  %v2670_v37 = vld [vmem:[#allocation2 + $0x69] sm:$0xff] }
 0x262   : > { %1872 = vmatprep.subr.mxu0 %v1493_v47  ;;  %1922 = vmatprep.subr.mxu1 %v1493_v47  ;;  %v1204_v18 = vadd.f32 %v1188_v11, %v1152_v36  ;;  %v1353_v44 = vmul.f32 %v2579_v24, %v2643_v61  ;;  %v1085_v52 = vmul.f32 %v2546_v59, %v1065_v43  ;;  %v2653_v21 = vld [vmem:[#allocation2 + $0x92] sm:$0xff]  ;;  %v2668_v38 = vld [vmem:[#allocation2 + $0x22] sm:$0xff]  ;;  %v2690_v55 = vld [vmem:[%s3086_s4] ss:$0 sm:$0xff] }
 0x263   : > { %1873 = vmatpush3.msra.mxu0 %v1493_v47  ;;  %1938 = vmatpush3.msra.mxu1 %v1493_v47  ;;  %v1160_v28 = vadd.f32 %v1144_v15, %v1108_v39  ;;  %v1049_v46 = vadd.f32 %v1033_v16, %v981_v41  ;;  %v1137_v0 = vmul.f32 %v2554_v31, %v2641_v49  ;;  %v1487_v33 = vld [vmem:[%s3087_s5 + $0x18] sm:$0xff]  ;;  %v2704_v16 = vld [vmem:[#allocation2 + $0x81] sm:$0xff] }
 0x264   : > { %1874 = vmatprep.subr.mxu0 %v1492_v27  ;;  %1923 = vmatprep.subr.mxu1 %v1492_v27  ;;  %v1256_v4 = vadd.f32 %v1240_v40, %v1204_v18  ;;  %v1405_v47 = vmul.f32 %v2590_v50, %v2653_v21  ;;  %v1189_v3 = vmul.f32 %v2557_v30, %v2657_v34  ;;  %v2674_v40 = vld [vmem:[#allocation2 + $0x38] sm:$0xff] }
 0x265   : > { %1875 = vmatpush3.msra.mxu0 %v1492_v27  ;;  %1939 = vmatpush3.msra.mxu1 %v1492_v27  ;;  %v1212_v6 = vadd.f32 %v1196_v53, %v1160_v28  ;;  %v1101_v29 = vadd.f32 %v1085_v52, %v1049_v46  ;;  %v1241_v11 = vmul.f32 %v2560_v10, %v2668_v38  ;;  %v2702_v28 = vld [vmem:[#allocation2 + $0x39] sm:$0xff] }
 0x266   : > { %1876 = vmatprep.subr.mxu0 %v1491_v63  ;;  %1924 = vmatprep.subr.mxu1 %v1491_v63  ;;  %v1309_v9 = vadd.f32 %v1293_v23, %v1256_v4  ;;  %v2678_v23 = vld [vmem:[#allocation2 + $0x80] sm:$0xff]  ;;  %v1294_v36 = vmul.f32 %v2576_v60, %v2674_v40  ;;  %v989_v15 = vmul.f32 %v2540_v57, %v2659_v45 }
 0x267   : > { %1877 = vmatpush3.msra.mxu0 %v1491_v63  ;;  %1940 = vmatpush3.msra.mxu1 %v1491_v63  ;;  %v1264_v27 = vadd.f32 %v1248_v5, %v1212_v6  ;;  %v2676_v63 = vld [vmem:[#allocation2 + $0x6a] sm:$0xff]  ;;  %v1153_v39 = vadd.f32 %v1137_v0, %v1101_v29  ;;  %v1041_v53 = vmul.f32 %v2543_v25, %v2670_v37  ;;  %v2714_v46 = vld [vmem:[#allocation2 + $0x3a] sm:$0xff] }
 0x268   : > { %1878 = vmatprep.subr.mxu0 %v1490_v26  ;;  %1925 = vmatprep.subr.mxu1 %v1490_v26  ;;  %v1361_v13 = vadd.f32 %v1345_v35, %v1309_v9  ;;  %v1486_v35 = vld [vmem:[%s3087_s5 + $0x10] sm:$0xff]  ;;  %v1145_v18 = vmul.f32 %v2554_v31, %v2678_v23  ;;  %3096 = vst [vmem:[#allocation4_spill] sm:$0xff] %v2704_v16  ;;  %v1484_v9 = vld [vmem:[%s3087_s5] sm:$0xff] }
 0x269   : > { %1879 = vmatpush3.msra.mxu0 %v1490_v26  ;;  %1941 = vmatpush3.msra.mxu1 %v1490_v26  ;;  %v1317_v19 = vadd.f32 %v1301_v20, %v1264_v27  ;;  %v1093_v26 = vmul.f32 %v2546_v59, %v2676_v63  ;;  %v1205_v20 = vadd.f32 %v1189_v3, %v1153_v39 }
 0x26a   : > { %1880 = vmatprep.subr.mxu0 %v1489_v51  ;;  %1926 = vmatprep.subr.mxu1 %v1489_v51  ;;  %v1413_v43 = vadd.f32 %v2626_v1, %v1361_v13  ;;  %v1057_v41 = vadd.f32 %v1041_v53, %v989_v15  ;;  %v1485_v1 = vld [vmem:[%s3087_s5 + $0x8] sm:$0xff]  ;;  %v1346_v4 = vmul.f32 %v2579_v24, %v2702_v28  ;;  %v2726_v15 = vld [vmem:[#allocation2 + $0x98] sm:$0xff] }
 0x26b   : > { %1881 = vmatpush3.msra.mxu0 %v1489_v51  ;;  %1942 = vmatpush3.msra.mxu1 %v1489_v51  ;;  %v1369_v5 = vadd.f32 %v1353_v44, %v1317_v19  ;;  %v1197_v44 = vmul.f32 %v2557_v30, %v2704_v16  ;;  %v1257_v6 = vadd.f32 %v1241_v11, %v1205_v20 }
 0x26c   : > { %1882 = vmatprep.subr.mxu0 %v1488_v58  ;;  %1927 = vmatprep.subr.mxu1 %v1488_v58  ;;  %v1436_v51 = vadd.f32 %v2690_v55, %v1413_v43  ;;  %v1109_v0 = vadd.f32 %v1093_v26, %v1057_v41  ;;  %v1398_v27 = vmul.f32 %v2590_v50, %v2714_v46 }
 0x26d   : > { %1883 = vmatpush3.msra.mxu0 %v1488_v58  ;;  %1943 = vmatpush3.msra.mxu1 %v1488_v58  ;;  %v1421_v52 = vadd.f32 %v1405_v47, %v1369_v5  ;;  %v2716_v58 = vld [vmem:[#allocation2 + $0x82] sm:$0xff]  ;;  %v1310_v11 = vadd.f32 %v1294_v36, %v1257_v6  ;;  %v982_v19 = vmul.f32 %v2551_v62, %v2540_v57 }
 0x26e   : > { %1884 = vmatprep.subr.mxu0 %v1487_v33  ;;  %1928 = vmatprep.subr.mxu1 %v1487_v33  ;;  %3097 = vst [vmem:[#allocation5_spill] sm:$0xff] %v2716_v58  ;;  %v1452_v3 = vmax.f32 %v1436_v51, 0.0  ;;  %v1249_v29 = vmul.f32 %v2560_v10, %v2716_v58  ;;  %v1034_v39 = vmul.f32 %v2585_v48, %v2543_v25 }
 0x26f   : > { %1885 = vmatpush3.msra.mxu0 %v1487_v33  ;;  %1944 = vmatpush3.msra.mxu1 %v1487_v33  ;;  %v1444_v47 = vadd.f32 %v2690_v55, %v1421_v52  ;;  %v1161_v33 = vadd.f32 %v1145_v18, %v1109_v0  ;;  %v1086_v53 = vmul.f32 %v2587_v8, %v2546_v59  ;;  %v2736_v18 = vld [vmem:[#allocation2 + $0x99] sm:$0xff] }
 0x270   : > { %1886 = vmatprep.subr.mxu0 %v1486_v35  ;;  %1929 = vmatprep.subr.mxu1 %v1486_v35  ;;  %v1468_v13 = vmin.f32 %v1452_v3, 6.0  ;;  %v1362_v43 = vadd.f32 %v1346_v4, %v1310_v11  ;;  %v1302_v26 = vmul.f32 %v2576_v60, %v2726_v15  ;;  %v1050_v5 = vadd.f32 %v1034_v39, %v982_v19  ;;  %v2753_v3 = vld [vmem:[#allocation2 + $0x49] sm:$0xff] }
 0x271   : > { %1887 = vmatpush3.msra.mxu0 %v1486_v35  ;;  %1945 = vmatpush3.msra.mxu1 %v1486_v35  ;;  %v1460_v35 = vmax.f32 %v1444_v47, 0.0  ;;  %v1213_v36 = vadd.f32 %v1197_v44, %v1161_v33  ;;  %v1138_v62 = vmul.f32 %v2605_v14, %v2554_v31  ;;  %v1354_v41 = vmul.f32 %v2579_v24, %v2736_v18 }
 0x272   : > { %1888 = vmatprep.subr.mxu0 %v1485_v1  ;;  %1930 = vmatprep.subr.mxu1 %v1485_v1  ;;  %v1414_v20 = vadd.f32 %v1398_v27, %v1362_v43  ;;  %v1102_v4 = vadd.f32 %v1086_v53, %v1050_v5  ;;  %v1190_v44 = vmul.f32 %v2612_v32, %v2557_v30  ;;  %v2765_v53 = vld [vmem:[#allocation2 + $0x4a] sm:$0xff] }
 0x273   : > { %1889 = vmatpush3.msra.mxu0 %v1485_v1  ;;  %1946 = vmatpush3.msra.mxu1 %v1485_v1  ;;  %v1476_v48 = vmin.f32 %v1460_v35, 6.0  ;;  %v1265_v8 = vadd.f32 %v1249_v29, %v1213_v36  ;;  %v2742_v1 = vld [vmem:[#allocation2 + $0x9a] sm:$0xff]  ;;  %v990_v52 = vmul.f32 %v2596_v12, %v2540_v57  ;;  %v1042_v27 = vmul.f32 %v2622_v17, %v2543_v25 }
 0x274   : > { %1890 = vmatprep.subr.mxu0 %v1484_v9  ;;  %1931 = vmatprep.subr.mxu1 %v1484_v9  ;;  %v1406_v51 = vmul.f32 %v2590_v50, %v2742_v1  ;;  %v1437_v6 = vadd.f32 %v2690_v55, %v1414_v20  ;;  %v1094_v29 = vmul.f32 %v2630_v2, %v2546_v59 }
 0x275   : > { %1891 = vmatpush3.msra.mxu0 %v1484_v9  ;;  %1947 = vmatpush3.msra.mxu1 %v1484_v9  ;;  %v1318_v0 = vadd.f32 %v1302_v26, %v1265_v8  ;;  %v2751_v9 = vld [vmem:[#allocation2 + $0x48] sm:$0xff]  ;;  %v1154_v47 = vadd.f32 %v1138_v62, %v1102_v4  ;;  %v1242_v11 = vmul.f32 %v2614_v56, %v2560_v10 }
 0x276   : > { %1892 = vmatprep.mubr.f32.mxu0 %v1468_v13  ;;  %1904 = vmatprep.mubr.f32.mxu1 %v1476_v48  ;;  %v1295_v33 = vmul.f32 %v2576_v60, %v2751_v9  ;;  %v1347_v13 = vmul.f32 %v2579_v24, %v2753_v3  ;;  %v1453_v19 = vmax.f32 %v1437_v6, 0.0  ;;  %v1058_v35 = vadd.f32 %v1042_v27, %v990_v52  ;;  %v2786_v27 = vld [vmem:[#allocation2 + $0xa9] sm:$0xff] }
 0x277   : > { %v1370_v39 = vadd.f32 %v1354_v41, %v1318_v0  ;;  %v1146_v43 = vmul.f32 %v2632_v42, %v2554_v31  ;;  %v1206_v36 = vadd.f32 %v1190_v44, %v1154_v47  ;;  %v1399_v26 = vmul.f32 %v2590_v50, %v2765_v53  ;;  %v2775_v41 = vld [vmem:[#allocation2 + $0xa8] sm:$0xff] }
 0x278   : > { %v1198_v5 = vmul.f32 %v2643_v61, %v2557_v30  ;;  %v983_v62 = vmul.f32 %v2641_v49, %v2540_v57  ;;  %v1469_v48 = vmin.f32 %v1453_v19, 6.0  ;;  %v1110_v8 = vadd.f32 %v1094_v29, %v1058_v35  ;;  %v2788_v29 = vld [vmem:[#allocation2 + $0xaa] sm:$0xff] }
 0x279   : > { %v1422_v20 = vadd.f32 %v1406_v51, %v1370_v39  ;;  %v1035_v4 = vmul.f32 %v2657_v34, %v2543_v25  ;;  %v1258_v52 = vadd.f32 %v1242_v11, %v1206_v36  ;;  %v1250_v44 = vmul.f32 %v2653_v21, %v2560_v10 }
 0x27a   : > { %v1303_v6 = vmul.f32 %v2576_v60, %v2775_v41  ;;  %v1087_v0 = vmul.f32 %v2668_v38, %v2546_v59  ;;  %1893 = vmatmul.mubr.f32.vlgmr.msra.gmra.mxu0 %v1469_v48  ;;  %v1162_v51 = vadd.f32 %v1146_v43, %v1110_v8  ;;  %v1139_v34 = vmul.f32 %v2674_v40, %v2554_v31 }
 0x27b   : > { %v1445_v49 = vadd.f32 %v2690_v55, %v1422_v20  ;;  %v1051_v47 = vadd.f32 %v1035_v4, %v983_v62  ;;  %v1311_v11 = vadd.f32 %v1295_v33, %v1258_v52  ;;  %v1355_v19 = vmul.f32 %v2579_v24, %v2786_v27  ;;  %v2802_v33 = vld [vmem:[#allocation2 + $0x50] sm:$0xff] }
 0x27c   : > { %v1407_v39 = vmul.f32 %v2590_v50, %v2788_v29  ;;  %v1191_v38 = vmul.f32 %v2702_v28, %v2557_v30  ;;  %v1214_v43 = vadd.f32 %v1198_v5, %v1162_v51  ;;  %v991_v48 = vmul.f32 %v2678_v23, %v2540_v57 }
 0x27d   : > { %v1461_v35 = vmax.f32 %v1445_v49, 0.0  ;;  %v1103_v36 = vadd.f32 %v1087_v0, %v1051_v47  ;;  %v1363_v62 = vadd.f32 %v1347_v13, %v1311_v11  ;;  %v1243_v20 = vmul.f32 %v2714_v46, %v2560_v10  ;;  %v2810_v0 = vld [vmem:[#allocation2 + $0x51] sm:$0xff] }
 0x27e   : > { %v1043_v8 = vmul.f32 %v2704_v16, %v2543_v25  ;;  %v1095_v4 = vmul.f32 %v2716_v58, %v2546_v59  ;;  %v1266_v2 = vadd.f32 %v1250_v44, %v1214_v43  ;;  %v1296_v5 = vmul.f32 %v2576_v60, %v2802_v33  ;;  %v2814_v47 = vld [vmem:[#allocation2 + $0x52] sm:$0xff] }
 0x27f   : > { %v1477_v52 = vmin.f32 %v1461_v35, 6.0  ;;  %v1155_v49 = vadd.f32 %v1139_v34, %v1103_v36  ;;  %v1415_v13 = vadd.f32 %v1399_v26, %v1363_v62  ;;  %v1348_v51 = vmul.f32 %v2579_v24, %v2810_v0 }
 0x280   : > { %v1059_v11 = vadd.f32 %v1043_v8, %v991_v48  ;;  %v1147_v16 = vmul.f32 %v2726_v15, %v2554_v31  ;;  %v1319_v58 = vadd.f32 %v1303_v6, %v1266_v2  ;;  %v1400_v44 = vmul.f32 %v2590_v50, %v2814_v47 }
 0x281   : > { %1905 = vmatmul.mubr.f32.vlgmr.msra.gmra.mxu1 %v1477_v52  ;;  %v1207_v35 = vadd.f32 %v1191_v38, %v1155_v49  ;;  %v1199_v34 = vmul.f32 %v2736_v18, %v2557_v30  ;;  %v1438_v26 = vadd.f32 %v2690_v55, %v1415_v13  ;;  %v984_v36 = vmul.f32 %v2605_v14, %v2540_v57  ;;  %v2831_v49 = vld [vmem:[#allocation2 + $0xb0] sm:$0xff] }
 0x282   : > { %v1111_v43 = vadd.f32 %v1095_v4, %v1059_v11  ;;  %v1036_v48 = vmul.f32 %v2612_v32, %v2543_v25  ;;  %v1371_v62 = vadd.f32 %v1355_v19, %v1319_v58  ;;  %v1251_v2 = vmul.f32 %v2742_v1, %v2560_v10  ;;  %v2833_v13 = vld [vmem:[#allocation2 + $0xb1] sm:$0xff] }
 0x283   : > { %v1259_v8 = vadd.f32 %v1243_v20, %v1207_v35  ;;  %v1088_v6 = vmul.f32 %v2614_v56, %v2546_v59  ;;  %v1454_v38 = vmax.f32 %v1438_v26, 0.0  ;;  %v1140_v14 = vmul.f32 %v2751_v9, %v2554_v31 }
 0x284   : > { %v1163_v52 = vadd.f32 %v1147_v16, %v1111_v43  ;;  %v1052_v4 = vadd.f32 %v1036_v48, %v984_v36  ;;  %v1423_v11 = vadd.f32 %v1407_v39, %v1371_v62  ;;  %v1304_v58 = vmul.f32 %v2576_v60, %v2831_v49  ;;  %v2848_v48 = vld [vmem:[#allocation2 + $0xb2] sm:$0xff] }
 0x285   : > { %v1312_v32 = vadd.f32 %v1296_v5, %v1259_v8  ;;  %v1356_v19 = vmul.f32 %v2579_v24, %v2833_v13  ;;  %v1470_v20 = vmin.f32 %v1454_v38, 6.0  ;;  %v1192_v16 = vmul.f32 %v2753_v3, %v2557_v30 }
 0x286   : > { %v1215_v56 = vadd.f32 %v1199_v34, %v1163_v52  ;;  %v1104_v35 = vadd.f32 %v1088_v6, %v1052_v4  ;;  %v1446_v26 = vadd.f32 %v2690_v55, %v1423_v11  ;;  %v1244_v36 = vmul.f32 %v2765_v53, %v2560_v10 }
 0x287   : > { %v1364_v43 = vadd.f32 %v1348_v51, %v1312_v32  ;;  %v992_v39 = vmul.f32 %v2632_v42, %v2540_v57  ;;  %1895 = vmatprep.mubr.f32.mxu0 %v1470_v20  ;;  %v1044_v34 = vmul.f32 %v2643_v61, %v2543_v25  ;;  %v1096_v8 = vmul.f32 %v2653_v21, %v2546_v59 }
 0x288   : > { %v1267_v5 = vadd.f32 %v1251_v2, %v1215_v56  ;;  %v1156_v62 = vadd.f32 %v1140_v14, %v1104_v35  ;;  %v1462_v6 = vmax.f32 %v1446_v26, 0.0  ;;  %v1408_v51 = vmul.f32 %v2590_v50, %v2848_v48 }
 0x289   : > { %v1416_v38 = vadd.f32 %v1400_v44, %v1364_v43  ;;  %v1297_v52 = vmul.f32 %v2576_v60, %v2570_v54  ;;  %v1060_v2 = vadd.f32 %v1044_v34, %v992_v39  ;;  %v1148_v14 = vmul.f32 %v2775_v41, %v2554_v31 }
 0x28a   : > { %v1320_v42 = vadd.f32 %v1304_v58, %v1267_v5  ;;  %v1208_v4 = vadd.f32 %v1192_v16, %v1156_v62  ;;  %v1478_v11 = vmin.f32 %v1462_v6, 6.0  ;;  %v1349_v21 = vmul.f32 %v2579_v24, %v2581_v7  ;;  %v2879_v6 = vld [vmem:[#allocation2 + $0xc1] sm:$0xff] }
 0x28b   : > { %v1439_v61 = vadd.f32 %v2690_v55, %v1416_v38  ;;  %v1401_v44 = vmul.f32 %v2590_v50, %v2583_v22  ;;  %v1112_v56 = vadd.f32 %v1096_v8, %v1060_v2  ;;  %v1200_v58 = vmul.f32 %v2786_v27, %v2557_v30 }
 0x28c   : > { %v1372_v32 = vadd.f32 %v1356_v19, %v1320_v42  ;;  %v1260_v20 = vadd.f32 %v1244_v36, %v1208_v4  ;;  %1907 = vmatprep.mubr.f32.mxu1 %v1478_v11  ;;  %v985_v16 = vmul.f32 %v2674_v40, %v2540_v57  ;;  %v1037_v26 = vmul.f32 %v2702_v28, %v2543_v25  ;;  %v2875_v36 = vld [vmem:[#allocation2 + $0xc0] sm:$0xff] }
 0x28d   : > { %v1455_v35 = vmax.f32 %v1439_v61, 0.0  ;;  %v1089_v43 = vmul.f32 %v2714_v46, %v2546_v59  ;;  %v1164_v62 = vadd.f32 %v1148_v14, %v1112_v56  ;;  %v1252_v19 = vmul.f32 %v2788_v29, %v2560_v10  ;;  %v2886_v42 = vld [vmem:[#allocation2 + $0xc2] sm:$0xff] }
 0x28e   : > { %v1424_v39 = vadd.f32 %v1408_v51, %v1372_v32  ;;  %v1313_v5 = vadd.f32 %v1297_v52, %v1260_v20  ;;  %v1305_v8 = vmul.f32 %v2576_v60, %v2875_v36  ;;  %v1053_v40 = vadd.f32 %v1037_v26, %v985_v16 }
 0x28f   : > { %v1471_v34 = vmin.f32 %v1455_v35, 6.0  ;;  %v1141_v28 = vmul.f32 %v2802_v33, %v2554_v31  ;;  %v1216_v51 = vadd.f32 %v1200_v58, %v1164_v62  ;;  %v1357_v52 = vmul.f32 %v2579_v24, %v2879_v6 }
 0x290   : > { %v1447_v46 = vadd.f32 %v2690_v55, %v1424_v39  ;;  %v1365_v38 = vadd.f32 %v1349_v21, %v1313_v5  ;;  %v1409_v4 = vmul.f32 %v2590_v50, %v2886_v42  ;;  %v1105_v2 = vadd.f32 %v1089_v43, %v1053_v40 }
 0x291   : > { %1896 = vmatmul.mubr.f32.gmra.mxu0 %v1471_v34  ;;  %v1193_v14 = vmul.f32 %v2810_v0, %v2557_v30  ;;  %v993_v11 = vmul.f32 %v2726_v15, %v2540_v57  ;;  %v1268_v21 = vadd.f32 %v1252_v19, %v1216_v51  ;;  %v1045_v20 = vmul.f32 %v2736_v18, %v2543_v25 }
 0x292   : > { %v1463_v61 = vmax.f32 %v1447_v46, 0.0  ;;  %v1417_v32 = vadd.f32 %v1401_v44, %v1365_v38  ;;  %v1157_v56 = vadd.f32 %v1141_v28, %v1105_v2  ;;  %v1245_v58 = vmul.f32 %v2814_v47, %v2560_v10 }
 0x293   : > { %v1097_v35 = vmul.f32 %v2742_v1, %v2546_v59  ;;  %v1149_v16 = vmul.f32 %v2831_v49, %v2554_v31  ;;  %v1321_v15 = vadd.f32 %v1305_v8, %v1268_v21  ;;  %v1061_v39 = vadd.f32 %v1045_v20, %v993_v11 }
 0x294   : > { %v1479_v26 = vmin.f32 %v1463_v61, 6.0  ;;  %v1440_v43 = vadd.f32 %v2690_v55, %v1417_v32  ;;  %v1209_v44 = vadd.f32 %v1193_v14, %v1157_v56  ;;  %v1298_v5 = vmul.f32 %v2576_v60, %v2659_v45  ;;  %v2919_v61 = vld [vmem:[#allocation2 + $0xc8] sm:$0xff] }
 0x295   : > { %v1350_v18 = vmul.f32 %v2579_v24, %v2670_v37  ;;  %v1373_v19 = vadd.f32 %v1357_v52, %v1321_v15  ;;  %v1113_v34 = vadd.f32 %v1097_v35, %v1061_v39  ;;  %v1201_v1 = vmul.f32 %v2833_v13, %v2557_v30  ;;  %v2921_v32 = vld [vmem:[#allocation2 + $0xc9] sm:$0xff] }
 0x296   : > { %1908 = vmatmul.mubr.f32.gmra.mxu1 %v1479_v26  ;;  %v1456_v62 = vmax.f32 %v1440_v43, 0.0  ;;  %v1261_v40 = vadd.f32 %v1245_v58, %v1209_v44  ;;  %v986_v28 = vmul.f32 %v2751_v9, %v2540_v57  ;;  %v1038_v8 = vmul.f32 %v2753_v3, %v2543_v25  ;;  %v2934_v43 = vld [vmem:[#allocation2 + $0xca] sm:$0xff] }
 0x297   : > { %v1090_v46 = vmul.f32 %v2765_v53, %v2546_v59  ;;  %v1425_v51 = vadd.f32 %v1409_v4, %v1373_v19  ;;  %v1165_v2 = vadd.f32 %v1149_v16, %v1113_v34  ;;  %v1253_v52 = vmul.f32 %v2848_v48, %v2560_v10 }
 0x298   : > { %v1472_v38 = vmin.f32 %v1456_v62, 6.0  ;;  %v1314_v14 = vadd.f32 %v1298_v5, %v1261_v40  ;;  %v1402_v11 = vmul.f32 %v2590_v50, %v2676_v63  ;;  %v1054_v9 = vadd.f32 %v1038_v8, %v986_v28 }
 0x299   : > { %v1142_v3 = vmul.f32 %v2554_v31, %v2570_v54  ;;  %v1448_v53 = vadd.f32 %v2690_v55, %v1425_v51  ;;  %v1217_v4 = vadd.f32 %v1201_v1, %v1165_v2  ;;  %v1306_v21 = vmul.f32 %v2576_v60, %v2919_v61  ;;  %v1287_v51 = vld [vmem:[#allocation2 + $0xd8] sm:$0xff] }
 0x29a   : > { %1898 = vmatprep.mubr.f32.mxu0 %v1472_v38  ;;  %v1358_v20 = vmul.f32 %v2579_v24, %v2921_v32  ;;  %v1366_v56 = vadd.f32 %v1350_v18, %v1314_v14  ;;  %v1106_v58 = vadd.f32 %v1090_v46, %v1054_v9  ;;  %v1194_v35 = vmul.f32 %v2557_v30, %v2581_v7  ;;  %v1339_v2 = vld [vmem:[#allocation2 + $0xd9] sm:$0xff]  ;;  %v3098_v14 = vld [vmem:[#allocation3_spill] sm:$0xff] }
 0x29b   : > { %v994_v16 = vmul.f32 %v2775_v41, %v2540_v57  ;;  %v1464_v26 = vmax.f32 %v1448_v53, 0.0  ;;  %v1269_v54 = vadd.f32 %v1253_v52, %v1217_v4  ;;  %v1046_v15 = vmul.f32 %v2786_v27, %v2543_v25 }
 0x29c   : > { %v1098_v39 = vmul.f32 %v2788_v29, %v2546_v59  ;;  %v1418_v44 = vadd.f32 %v1402_v11, %v1366_v56  ;;  %v1410_v5 = vmul.f32 %v2590_v50, %v2934_v43  ;;  %v1158_v18 = vadd.f32 %v1142_v3, %v1106_v58  ;;  %v1391_v56 = vld [vmem:[#allocation2 + $0xda] sm:$0xff] }
 0x29d   : > { %v1246_v7 = vmul.f32 %v2560_v10, %v2583_v22  ;;  %v1480_v62 = vmin.f32 %v1464_v26, 6.0  ;;  %v1322_v41 = vadd.f32 %v1306_v21, %v1269_v54  ;;  %v1062_v19 = vadd.f32 %v1046_v15, %v994_v16 }
 0x29e   : > { %v1150_v34 = vmul.f32 %v2875_v36, %v2554_v31  ;;  %v1441_v1 = vadd.f32 %v2690_v55, %v1418_v44  ;;  %v1210_v27 = vadd.f32 %v1194_v35, %v1158_v18  ;;  %v1299_v29 = vmul.f32 %v2576_v60, %v2596_v12 }
 0x29f   : > { %v1351_v40 = vmul.f32 %v2579_v24, %v2622_v17  ;;  %1910 = vmatprep.mubr.f32.mxu1 %v1480_v62  ;;  %v1374_v28 = vadd.f32 %v1358_v20, %v1322_v41  ;;  %v1114_v8 = vadd.f32 %v1098_v39, %v1062_v19  ;;  %v1202_v22 = vmul.f32 %v2879_v6, %v2557_v30 }
 0x2a0   : > { %v987_v46 = vmul.f32 %v2802_v33, %v2540_v57  ;;  %v1457_v38 = vmax.f32 %v1441_v1, 0.0  ;;  %v1262_v36 = vadd.f32 %v1246_v7, %v1210_v27  ;;  %v1039_v52 = vmul.f32 %v2810_v0, %v2543_v25  ;;  %v1288_v27 = vld [vmem:[#allocation2 + $0xe0] sm:$0xff] }
 0x2a1   : > { %v1091_v12 = vmul.f32 %v2814_v47, %v2546_v59  ;;  %v1426_v17 = vadd.f32 %v1410_v5, %v1374_v28  ;;  %v1403_v11 = vmul.f32 %v2590_v50, %v3098_v14  ;;  %v1166_v9 = vadd.f32 %v1150_v34, %v1114_v8  ;;  %v3099_v34 = vld [vmem:[#allocation4_spill] sm:$0xff] }
 0x2a2   : > { %v1254_v6 = vmul.f32 %v2886_v42, %v2560_v10  ;;  %v1473_v3 = vmin.f32 %v1457_v38, 6.0  ;;  %v1315_v33 = vadd.f32 %v1299_v29, %v1262_v36  ;;  %v1055_v53 = vadd.f32 %v1039_v52, %v987_v46  ;;  %v1392_v36 = vld [vmem:[#allocation2 + $0xe2] sm:$0xff] }
 0x2a3   : > { %v1143_v4 = vmul.f32 %v2554_v31, %v2659_v45  ;;  %v1449_v21 = vadd.f32 %v2690_v55, %v1426_v17  ;;  %v1218_v0 = vadd.f32 %v1202_v22, %v1166_v9  ;;  %v1307_v20 = vmul.f32 %v2576_v60, %v1287_v51  ;;  %v1340_v22 = vld [vmem:[#allocation2 + $0xe1] sm:$0xff] }
 0x2a4   : > { %v1359_v47 = vmul.f32 %v2579_v24, %v1339_v2  ;;  %1899 = vmatmul.mubr.f32.gmra.mxu0 %v1473_v3  ;;  %v1367_v58 = vadd.f32 %v1351_v40, %v1315_v33  ;;  %v1107_v35 = vadd.f32 %v1091_v12, %v1055_v53  ;;  %v1195_v42 = vmul.f32 %v2557_v30, %v2670_v37 }
 0x2a5   : > { %v995_v16 = vmul.f32 %v2831_v49, %v2540_v57  ;;  %v1465_v26 = vmax.f32 %v1449_v21, 0.0  ;;  %v1270_v54 = vadd.f32 %v1254_v6, %v1218_v0  ;;  %v1047_v45 = vmul.f32 %v2833_v13, %v2543_v25 }
 0x2a6   : > { %v1099_v15 = vmul.f32 %v2848_v48, %v2546_v59  ;;  %v1419_v39 = vadd.f32 %v1403_v11, %v1367_v58  ;;  %v1411_v44 = vmul.f32 %v2590_v50, %v1391_v56  ;;  %v1159_v5 = vadd.f32 %v1143_v4, %v1107_v35  ;;  %v1653_v4 = vld [vmem:[%s2165_s9 + $0x8] sm:$0xff] }
 0x2a7   : > { %v1247_v18 = vmul.f32 %v2560_v10, %v2676_v63  ;;  %v1481_v7 = vmin.f32 %v1465_v26, 6.0  ;;  %v1323_v37 = vadd.f32 %v1307_v20, %v1270_v54  ;;  %v1063_v62 = vadd.f32 %v1047_v45, %v995_v16  ;;  %v1661_v35 = vld [vmem:[%s2165_s9 + $0x48] sm:$0xff]  ;;  %v1660_v26 = vld [vmem:[%s2165_s9 + $0x40] sm:$0xff] }
 0x2a8   : > { %v1151_v57 = vmul.f32 %v2919_v61, %v2554_v31  ;;  %v1442_v49 = vadd.f32 %v2690_v55, %v1419_v39  ;;  %v1211_v41 = vadd.f32 %v1195_v42, %v1159_v5  ;;  %v1300_v25 = vmul.f32 %v2576_v60, %v2678_v23  ;;  %v3100_v23 = vld [vmem:[#allocation5_spill] sm:$0xff] }
 0x2a9   : > { %1911 = vmatmul.mubr.f32.gmra.mxu1 %v1481_v7  ;;  %v1375_v59 = vadd.f32 %v1359_v47, %v1323_v37  ;;  %v1115_v13 = vadd.f32 %v1099_v15, %v1063_v62  ;;  %v1203_v48 = vmul.f32 %v2921_v32, %v2557_v30  ;;  %v1352_v1 = vmul.f32 %v2579_v24, %v3099_v34  ;;  %v1654_v7 = vld [vmem:[%s2165_s9 + $0x10] sm:$0xff] }
 0x2aa   : > { %v1458_v19 = vmax.f32 %v1442_v49, 0.0  ;;  %v1263_v63 = vadd.f32 %v1247_v18, %v1211_v41  ;;  %v1255_v61 = vmul.f32 %v2934_v43, %v2560_v10  ;;  %v1404_v8 = vmul.f32 %v2590_v50, %v3100_v23  ;;  %v1663_v49 = vld [vmem:[%s2165_s9 + $0x58] sm:$0xff]  ;;  %v1665_v23 = vld [vmem:[%s2165_s9 + $0x68] sm:$0xff] }
 0x2ab   : > { %v1427_v29 = vadd.f32 %v1411_v44, %v1375_v59  ;;  %v1167_v31 = vadd.f32 %v1151_v57, %v1115_v13  ;;  %v1308_v32 = vmul.f32 %v2576_v60, %v1288_v27  ;;  %v1360_v52 = vmul.f32 %v2579_v24, %v1340_v22  ;;  %v1655_v44 = vld [vmem:[%s2165_s9 + $0x18] sm:$0xff]  ;;  %v1662_v13 = vld [vmem:[%s2165_s9 + $0x50] sm:$0xff] }
 0x2ac   : > { %v1474_v40 = vmin.f32 %v1458_v19, 6.0  ;;  %v1316_v28 = vadd.f32 %v1300_v25, %v1263_v63  ;;  %v1412_v17 = vmul.f32 %v2590_v50, %v1392_v36  ;;  %v3001_v50 = vld [vmem:[%s3088_s6] ss:$0 sm:$0xff] }
 0x2ad   : > { %v1450_v46 = vadd.f32 %v2690_v55, %v1427_v29  ;;  %v1219_v30 = vadd.f32 %v1203_v48, %v1167_v31  ;;  %v1656_v31 = vld [vmem:[%s2165_s9 + $0x20] sm:$0xff] }
 0x2ae   : > { %1901 = vmatprep.mubr.f32.mxu0 %v1474_v40  ;;  %v1368_v38 = vadd.f32 %v1352_v1, %v1316_v28  ;;  %v1657_v1 = vld [vmem:[%s2165_s9 + $0x28] sm:$0xff] }
 0x2af   : > { %v1466_v51 = vmax.f32 %v1450_v46, 0.0  ;;  %v1271_v2 = vadd.f32 %v1255_v61, %v1219_v30  ;;  %v1664_v30 = vld [vmem:[%s2165_s9 + $0x60] sm:$0xff] }
 0x2b0   : > { %v1420_v12 = vadd.f32 %v1404_v8, %v1368_v38 }
 0x2b1   : > { %v1482_v10 = vmin.f32 %v1466_v51, 6.0  ;;  %v1324_v43 = vadd.f32 %v1308_v32, %v1271_v2  ;;  %v1659_v2 = vld [vmem:[%s2165_s9 + $0x38] sm:$0xff] }
 0x2b2   : > { %v1443_v14 = vadd.f32 %v2690_v55, %v1420_v12 }
 0x2b3   : > { %1913 = vmatprep.mubr.f32.mxu1 %v1482_v10  ;;  %v1376_v11 = vadd.f32 %v1360_v52, %v1324_v43  ;;  %v1658_v10 = vld [vmem:[%s2165_s9 + $0x30] sm:$0xff] }
 0x2b4   : > { %v1459_v9 = vmax.f32 %v1443_v14, 0.0 }
 0x2b5   : > { %v1428_v60 = vadd.f32 %v1412_v17, %v1376_v11  ;;  %v1667_v11 = vld [vmem:[%s2165_s9 + $0x78] sm:$0xff] }
 0x2b6   : > { %v1475_v6 = vmin.f32 %v1459_v9, 6.0 }
 0x2b7   : > { %v1451_v3 = vadd.f32 %v2690_v55, %v1428_v60  ;;  %v1652_v55 = vld [vmem:[%s2165_s9] sm:$0xff] }
 0x2b8   : > { %1902 = vmatmul.mubr.f32.gmra.mxu0 %v1475_v6 }
 0x2b9   : > { %v1467_v24 = vmax.f32 %v1451_v3, 0.0  ;;  %v1666_v3 = vld [vmem:[%s2165_s9 + $0x70] sm:$0xff] }
 0x2bb   : > { %v1483_v33 = vmin.f32 %v1467_v24, 6.0 }
 0x2bd   : > { %1914 = vmatmul.mubr.f32.gmra.mxu1 %v1483_v33 }
 0x33a   : > { %v1894_v53 = vpop.f32.mrf.mxu0 }
 0x33b   : > { %v1579_v21 = vadd.f32 %v1894_v53, %v3001_v50 }
 0x33c   : > { %v1573_v0 = vpop.f32.mrf.mxu0 }
 0x33d   : > { %v1669_v20 = vadd.f32 %v1653_v4, %v1579_v21  ;;  %v1574_v47 = vadd.f32 %v3001_v50, %v1573_v0 }
 0x33f   : > { %1686 = vst.msk [vmem:[%s2162_s23 + $0x8] sm:$0xff] %vm1684_vm0, %v1669_v20  ;;  %v1668_v56 = vadd.f32 %v1652_v55, %v1574_v47 }
 0x341   : > { %v1906_v58 = vpop.f32.mrf.mxu1  ;;  %1685 = vst.msk [vmem:[%s2162_s23] sm:$0xff] %vm1684_vm0, %v1668_v56 }
 0x342   : > { %v1619_v42 = vadd.f32 %v1906_v58, %v3001_v50 }
 0x343   : > { %v1613_v16 = vpop.f32.mrf.mxu1 }
 0x344   : > { %v1677_v54 = vadd.f32 %v1661_v35, %v1619_v42  ;;  %v1614_v45 = vadd.f32 %v3001_v50, %v1613_v16 }
 0x346   : > { %1694 = vst.msk [vmem:[%s2162_s23 + $0x48] sm:$0xff] %vm1684_vm0, %v1677_v54  ;;  %v1676_v15 = vadd.f32 %v1660_v26, %v1614_v45 }
 0x348   : > { %1693 = vst.msk [vmem:[%s2162_s23 + $0x40] sm:$0xff] %vm1684_vm0, %v1676_v15 }
 0x351   : > { %v1897_v39 = vpop.f32.mrf.mxu0 }
 0x352   : > { %v1589_v5 = vadd.f32 %v1897_v39, %v3001_v50 }
 0x353   : > { %v1583_v18 = vpop.f32.mrf.mxu0 }
 0x354   : > { %v1671_v37 = vadd.f32 %v1655_v44, %v1589_v5  ;;  %v1584_v62 = vadd.f32 %v3001_v50, %v1583_v18 }
 0x356   : > { %1688 = vst.msk [vmem:[%s2162_s23 + $0x18] sm:$0xff] %vm1684_vm0, %v1671_v37  ;;  %v1909_v57 = vpop.f32.mrf.mxu1  ;;  %v1670_v41 = vadd.f32 %v1654_v7, %v1584_v62 }
 0x357   : > { %v1629_v25 = vadd.f32 %v1909_v57, %v3001_v50 }
 0x358   : > { %1687 = vst.msk [vmem:[%s2162_s23 + $0x10] sm:$0xff] %vm1684_vm0, %v1670_v41  ;;  %v1623_v59 = vpop.f32.mrf.mxu1 }
 0x359   : > { %v1679_v48 = vadd.f32 %v1663_v49, %v1629_v25  ;;  %v1624_v19 = vadd.f32 %v3001_v50, %v1623_v59 }
 0x35b   : > { %1696 = vst.msk [vmem:[%s2162_s23 + $0x58] sm:$0xff] %vm1684_vm0, %v1679_v48  ;;  %v1678_v63 = vadd.f32 %v1662_v13, %v1624_v19 }
 0x35d   : > { %1695 = vst.msk [vmem:[%s2162_s23 + $0x50] sm:$0xff] %vm1684_vm0, %v1678_v63 }
 0x364   : > { %v1900_v34 = vpop.f32.mrf.mxu0 }
 0x365   : > { %v1599_v27 = vadd.f32 %v1900_v34, %v3001_v50 }
 0x366   : > { %v1593_v29 = vpop.f32.mrf.mxu0 }
 0x367   : > { %v1673_v61 = vadd.f32 %v1657_v1, %v1599_v27  ;;  %v1594_v40 = vadd.f32 %v3001_v50, %v1593_v29 }
 0x369   : > { %1690 = vst.msk [vmem:[%s2162_s23 + $0x28] sm:$0xff] %vm1684_vm0, %v1673_v61  ;;  %v1912_v28 = vpop.f32.mrf.mxu1  ;;  %v1672_v8 = vadd.f32 %v1656_v31, %v1594_v40 }
 0x36a   : > { %v1639_v22 = vadd.f32 %v1912_v28, %v3001_v50 }
 0x36b   : > { %1689 = vst.msk [vmem:[%s2162_s23 + $0x20] sm:$0xff] %vm1684_vm0, %v1672_v8  ;;  %v1633_v46 = vpop.f32.mrf.mxu1 }
 0x36c   : > { %v1681_v32 = vadd.f32 %v1665_v23, %v1639_v22  ;;  %v1634_v38 = vadd.f32 %v3001_v50, %v1633_v46 }
 0x36e   : > { %1698 = vst.msk [vmem:[%s2162_s23 + $0x68] sm:$0xff] %vm1684_vm0, %v1681_v32  ;;  %v1680_v36 = vadd.f32 %v1664_v30, %v1634_v38 }
 0x370   : > { %1697 = vst.msk [vmem:[%s2162_s23 + $0x60] sm:$0xff] %vm1684_vm0, %v1680_v36 }
 0x378   : > { %v1903_v51 = vpop.f32.mrf.mxu0 }
 0x379   : > { %v1609_v52 = vadd.f32 %v1903_v51, %v3001_v50 }
 0x37a   : > { %v1603_v12 = vpop.f32.mrf.mxu0 }
 0x37b   : > { %v1675_v43 = vadd.f32 %v1659_v2, %v1609_v52  ;;  %v1604_v17 = vadd.f32 %v3001_v50, %v1603_v12 }
 0x37d   : > { %1692 = vst.msk [vmem:[%s2162_s23 + $0x38] sm:$0xff] %vm1684_vm0, %v1675_v43  ;;  %v1915_v14 = vpop.f32.mrf.mxu1  ;;  %v1674_v9 = vadd.f32 %v1658_v10, %v1604_v17 }
 0x37e   : > { %v1649_v60 = vadd.f32 %v1915_v14, %v3001_v50 }
 0x37f   : > { %1691 = vst.msk [vmem:[%s2162_s23 + $0x30] sm:$0xff] %vm1684_vm0, %v1674_v9  ;;  %v1643_v6 = vpop.f32.mrf.mxu1 }
 0x380   : > { %v1683_v24 = vadd.f32 %v1667_v11, %v1649_v60  ;;  %v1644_v33 = vadd.f32 %v3001_v50, %v1643_v6 }
 0x382   : > { %1700 = vst.msk [vmem:[%s2162_s23 + $0x78] sm:$0xff] %vm1684_vm0, %v1683_v24  ;;  %v1682_v53 = vadd.f32 %v1666_v3, %v1644_v33 }
 0x384   : > { %1699 = vst.msk [vmem:[%s2162_s23 + $0x70] sm:$0xff] %vm1684_vm0, %v1682_v53 }
 0x385 PF: > { %s17_s28 = sadd.s32 1, %s2059_s28   ;;  %s3101_s24 = smov %s2051_s26 }
 0x386   : > { %p14_p9 = scmp.ge.s32.totalorder %s17_s28, 6   ;;  %s3102_s25 = smov %s2055_s27 }
 0x387   : > { %s3103_s26 = smov %s3106_s29  ;;  %s3104_s27 = smov %s3110_s30 }
 0x388   :  { %16 = sbr.rel (!%p14_p9) target bundleno = 3 (0x3), region = 92 }

</bundles_post_ra>
